<compile_context>
chip_gen: v7x
topology: tpu7x:2x2x1
jax: 0.10.0
libtpu: 0.0.40
codegen_flags: <defaults>
</compile_context>

<pallas_src>
import functools
import math

import jax
import jax.numpy as jnp
from jax.experimental import pallas as pl
from jax.experimental.pallas import tpu as pltpu


# ---------------------------------------------------------------------------
# Fused kernel: embed -> NLAYERS x (pre-LN attn + pre-LN FFN) -> linear decoder
# All activations are [N, D] with N = B*S (batch flattened into sublanes).
# ---------------------------------------------------------------------------
def _fused_transformer_kernel(obs_ref, biaspe_ref, maskb_ref, ew_ref,
                              wqkv_ref, bqkv_ref, wo_ref, bo_ref,
                              w1_ref, b1_ref, w2_ref, b2_ref,
                              dw_ref, db_ref, o_ref,
                              *, nlayers, nhead, d_model, mxu_dtype):
    f32 = jnp.float32
    D = d_model
    hd = D // nhead

    # --- limb embedding (sqrt(d_model) pre-folded into ew / biaspe) + learnt PE ---------
    # EMBEDDING_DROPOUT=False -> dropout is identity (dropout_mask = 0.0 in torch code).
    x = jnp.dot(obs_ref[...], ew_ref[...], preferred_element_type=f32) + biaspe_ref[...]

    # key-padding + cross-batch block-diagonal additive bias, loaded ONCE.  [N, N]
    mask_bias = maskb_ref[...]

    def normalize(v):  # LayerNorm with gamma/beta folded into the following weights
        mu = jnp.mean(v, axis=-1, keepdims=True)
        var = jnp.mean(jnp.square(v - mu), axis=-1, keepdims=True)
        return (v - mu) * jax.lax.rsqrt(var + 1e-5)

    for l in range(nlayers):            # static unroll; weights resident in VMEM
        # -- pre-LN residual multi-head self-attention block --
        xn = normalize(x).astype(mxu_dtype)                       # one cast per layer
        qkv = jnp.dot(xn, wqkv_ref[l], preferred_element_type=f32) + bqkv_ref[l]
        qkv = qkv.astype(mxu_dtype)                                # single cast of [N, 3D]
        heads = []
        for h in range(nhead):          # static contiguous hd-chunk slices (no matmuls)
            qh = qkv[:, h * hd:(h + 1) * hd]                       # 1/sqrt(hd) pre-folded
            kh = qkv[:, D + h * hd:D + (h + 1) * hd]
            vh = qkv[:, 2 * D + h * hd:2 * D + (h + 1) * hd]
            sc = jnp.einsum('nc,mc->nm', qh, kh,
                            preferred_element_type=f32) + mask_bias
            sc = sc - jnp.max(sc, axis=-1, keepdims=True)
            p = jnp.exp(sc)
            # approx reciprocal (EUP slot); parity vs torch needs a loosened tolerance.
            p = p * pl.reciprocal(jnp.sum(p, axis=-1, keepdims=True), approx=True)
            heads.append(jnp.dot(p.astype(mxu_dtype), vh, preferred_element_type=f32))
        ctx = jnp.concatenate(heads, axis=-1).astype(mxu_dtype)    # [N, D]
        x = x + jnp.dot(ctx, wo_ref[l], preferred_element_type=f32) + bo_ref[l]

        # -- pre-LN residual feed-forward block --
        xn2 = normalize(x).astype(mxu_dtype)
        hh = jnp.dot(xn2, w1_ref[l], preferred_element_type=f32) + b1_ref[l]
        hh = jnp.maximum(hh, 0.0).astype(mxu_dtype)                # ReLU
        x = x + jnp.dot(hh, w2_ref[l], preferred_element_type=f32) + b2_ref[l]

    # -- linear decoder; written as [N, OUT]; wrapper reshapes to [B, S*OUT] (free) --
    o_ref[...] = jnp.dot(x.astype(mxu_dtype), dw_ref[...],
                         preferred_element_type=f32) + db_ref[...]


# ---------------------------------------------------------------------------
# Parameters (deterministic synthetic init; logical shapes follow nn.Module __init__,
# then folded / stacked on the HOST for the fused kernel)
# ---------------------------------------------------------------------------
def init_params(key, *, seq_len, limb_obs_size, d_model, dim_ff, nlayers, nhead,
                out_dim, mxu_dtype=jnp.bfloat16):
    hd = d_model // nhead
    keys = iter(jax.random.split(key, 8 + 16 * nlayers))

    def uni(shape, scl=0.1):
        return jax.random.uniform(next(keys), shape, jnp.float32, -scl, scl)

    p = {}
    # limb_embed: nn.Linear(limb_obs_size, d_model); EMBEDDING_SCALE sqrt(D) folded in.
    p['embed_w'] = (uni((limb_obs_size, d_model)) * math.sqrt(d_model)).astype(mxu_dtype)
    p['embed_b'] = uni((d_model,)) * math.sqrt(d_model)
    # PositionalEncoding: pe = Parameter(randn(seq_len, 1, d_model)); stored as [S, D].
    p['pe'] = jax.random.normal(next(keys), (seq_len, d_model), jnp.float32)

    wqkv, bqkv, wo, bo, w1f, b1f, w2, b2 = [], [], [], [], [], [], [], []
    for _ in range(nlayers):
        Wq, Wk, Wv, Wo = [uni((d_model, d_model)) for _ in range(4)]
        Bq, Bk, Bv, Bo = [uni((d_model,)) for _ in range(4)]
        g1, b1_ln = jnp.ones((d_model,), jnp.float32), jnp.zeros((d_model,), jnp.float32)
        g2, b2_ln = jnp.ones((d_model,), jnp.float32), jnp.zeros((d_model,), jnp.float32)
        W1, B1 = uni((d_model, dim_ff)), uni((dim_ff,))
        W2, B2 = uni((dim_ff, d_model)), uni((d_model,))

        inv = 1.0 / math.sqrt(hd)
        # Fold LN1 gamma/beta into Q/K/V; fold 1/sqrt(hd) into Q.
        Wq_f = (g1[:, None] * Wq) * inv
        bq_f = (b1_ln @ Wq + Bq) * inv
        Wk_f, bk_f = g1[:, None] * Wk, b1_ln @ Wk + Bk
        Wv_f, bv_f = g1[:, None] * Wv, b1_ln @ Wv + Bv
        wqkv.append(jnp.concatenate([Wq_f, Wk_f, Wv_f], axis=1))          # [D, 3D]
        bqkv.append(jnp.concatenate([bq_f, bk_f, bv_f])[None, :])         # [1, 3D]
        wo.append(Wo)                                                      # [D, D]
        bo.append(Bo[None, :])                                             # [1, D]
        # Fold LN2 gamma/beta into the first FFN matmul.
        w1f.append(g2[:, None] * W1)                                       # [D, FF]
        b1f.append((b2_ln @ W1 + B1)[None, :])                             # [1, FF]
        w2.append(W2)
        b2.append(B2[None, :])

    p['wqkv'] = jnp.stack(wqkv, 0).astype(mxu_dtype)   # [NL, D, 3D]
    p['bqkv'] = jnp.stack(bqkv, 0)                     # [NL, 1, 3D]
    p['wo'] = jnp.stack(wo, 0).astype(mxu_dtype)       # [NL, D, D]
    p['bo'] = jnp.stack(bo, 0)                         # [NL, 1, D]
    p['w1'] = jnp.stack(w1f, 0).astype(mxu_dtype)      # [NL, D, FF]
    p['b1'] = jnp.stack(b1f, 0)                        # [NL, 1, FF]
    p['w2'] = jnp.stack(w2, 0).astype(mxu_dtype)       # [NL, FF, D]
    p['b2'] = jnp.stack(b2, 0)                         # [NL, 1, D]
    # decoder: nn.Linear(d_model, decoder_out_dim), bias zeroed in init_weights()
    p['dec_w'] = uni((d_model, out_dim)).astype(mxu_dtype)
    p['dec_b'] = jnp.zeros((1, out_dim), jnp.float32)
    return p


# ---------------------------------------------------------------------------
# Forward (mirrors TransformerModel.forward for the chosen config)
# ---------------------------------------------------------------------------
def transformer_model_forward(params, obs, obs_mask, *, nhead):
    # obs: [S, B, L] (seq-first, as in PyTorch); obs_mask: [B, S], 1.0 = padded limb
    S, B, L = obs.shape
    D = params['pe'].shape[-1]
    OUT = params['dec_b'].shape[-1]
    nlayers = params['wqkv'].shape[0]
    dim_ff = params['w1'].shape[-1]
    N = B * S
    mxu_dtype = params['embed_w'].dtype

    # Flatten batch into sublanes: [S, B, L] -> [B*S, L], already bf16 (halves input DMA).
    obs_flat = jnp.transpose(obs, (1, 0, 2)).reshape(N, L).astype(mxu_dtype)

    # Embed bias (sqrt(D) pre-folded) + learnt PE per flattened position.  [N, D] f32
    bias_pe = jnp.tile(params['embed_b'][None, :] + params['pe'], (B, 1))

    # Additive score bias combining key-padding mask (1.0 = padded key) with a
    # block-diagonal (cross-batch = -1e30) term.  [N, N] f32
    # NOTE: a fully-padded query row yields uniform weights (torch softmax over all -inf
    # would produce NaN) — intentional divergence; assumes >=1 unpadded limb per robot.
    batch_id = jnp.repeat(jnp.arange(B), S)
    same_batch = batch_id[:, None] == batch_id[None, :]
    key_ok = (obs_mask.astype(jnp.float32).reshape(N) <= 0.5)[None, :]
    mask_bias = jnp.where(same_batch & key_ok, 0.0, -1e30).astype(jnp.float32)

    # TODO(synk): hfield encoder / FIX_ATTENTION / HYPERNET / SWAT / PER_NODE_* branches
    # and the return_attention=True attention-map path are disabled by this config and
    # are not implemented.

    kernel = functools.partial(_fused_transformer_kernel,
                               nlayers=nlayers, nhead=nhead, d_model=D,
                               mxu_dtype=mxu_dtype)
    args = (obs_flat, bias_pe, mask_bias, params['embed_w'],
            params['wqkv'], params['bqkv'], params['wo'], params['bo'],
            params['w1'], params['b1'], params['w2'], params['b2'],
            params['dec_w'], params['dec_b'])
    out_shape = jax.ShapeDtypeStruct((N, OUT), jnp.float32)

    hd = D // nhead
    flops = (2 * N * L * D
             + nlayers * (2 * N * D * 3 * D          # fused QKV
                          + nhead * 4 * N * N * hd    # scores + PV
                          + 2 * N * D * D             # output projection
                          + 4 * N * D * dim_ff)       # FFN
             + 2 * N * D * OUT)
    transcendentals = nlayers * (nhead * (N * N + N) + 2 * N)   # exp + rsqrt/recip
    bytes_accessed = sum(int(a.size) * a.dtype.itemsize for a in args) \
        + int(N * OUT) * 4
    cost = pl.CostEstimate(flops=flops, transcendentals=transcendentals,
                           bytes_accessed=bytes_accessed)

    output = pl.pallas_call(
        kernel,
        out_shape=out_shape,
        in_specs=[pl.BlockSpec(memory_space=pltpu.MemorySpace.VMEM)] * len(args),
        out_specs=pl.BlockSpec(memory_space=pltpu.MemorySpace.VMEM),
        cost_estimate=cost,
    )(*args)

    # free XLA reshape == torch: decoder_out.permute(1, 0, 2).reshape(batch_size, -1)
    output = output.reshape(B, S * OUT)
    attention_maps = None
    return output, attention_maps


if __name__ == "__main__":
    # small shapes consistent with the module:
    # MAX_LIMBS (seq) = 8, batch = 2, limb_obs_size = 16, LIMB_EMBED_SIZE = 32,
    # NHEAD = 2, DIM_FEEDFORWARD = 64, NLAYERS = 2, decoder_out_dim = 4
    S, B, L = 8, 2, 16
    D, NHEAD, FF, NLAYERS, OUT = 32, 2, 64, 2, 4

    key = jax.random.PRNGKey(0)
    pkey, okey = jax.random.split(key)
    params = init_params(pkey, seq_len=S, limb_obs_size=L, d_model=D, dim_ff=FF,
                         nlayers=NLAYERS, nhead=NHEAD, out_dim=OUT)

    obs = jax.random.normal(okey, (S, B, L), jnp.float32)
    # key padding mask: batch 0 has no padding, batch 1 has its last 3 limbs padded
    obs_mask = (jnp.arange(S)[None, :] >= jnp.array([[S], [S - 3]])).astype(jnp.float32)

    fwd = jax.jit(transformer_model_forward, static_argnames=('nhead',))
    out, attn_maps = fwd(params, obs, obs_mask, nhead=NHEAD)
    jax.block_until_ready(out)
    assert out.shape == (B, S * OUT)
    assert attn_maps is None
    assert bool(jnp.all(jnp.isfinite(out)))
    print("KERNEL_OK")
</pallas_src>

<mosaic_0001>
module attributes {stable_mosaic.version = 11 : i64} {
  func.func @_fused_transformer_kernel(%arg0: memref<16x16xbf16, #tpu.memory_space<vmem>>, %arg1: memref<16x32xf32, #tpu.memory_space<vmem>>, %arg2: memref<16x16xf32, #tpu.memory_space<vmem>>, %arg3: memref<16x32xbf16, #tpu.memory_space<vmem>>, %arg4: memref<2x32x96xbf16, #tpu.memory_space<vmem>>, %arg5: memref<2x1x96xf32, #tpu.memory_space<vmem>>, %arg6: memref<2x32x32xbf16, #tpu.memory_space<vmem>>, %arg7: memref<2x1x32xf32, #tpu.memory_space<vmem>>, %arg8: memref<2x32x64xbf16, #tpu.memory_space<vmem>>, %arg9: memref<2x1x64xf32, #tpu.memory_space<vmem>>, %arg10: memref<2x64x32xbf16, #tpu.memory_space<vmem>>, %arg11: memref<2x1x32xf32, #tpu.memory_space<vmem>>, %arg12: memref<32x4xbf16, #tpu.memory_space<vmem>>, %arg13: memref<1x4xf32, #tpu.memory_space<vmem>>, %arg14: memref<16x4xf32, #tpu.memory_space<vmem>>) attributes {dimension_semantics = [], scalar_prefetch = 0 : i64, scratch_operands = 0 : i64, tpu.core_type = #tpu.core_type<tc>} {
    %c0 = arith.constant 0 : index
    %c0_0 = arith.constant 0 : index
    %0 = vector.load %arg0[%c0, %c0_0] : memref<16x16xbf16, #tpu.memory_space<vmem>>, vector<16x16xbf16>
    %c0_1 = arith.constant 0 : index
    %c0_2 = arith.constant 0 : index
    %1 = vector.load %arg3[%c0_1, %c0_2] : memref<16x32xbf16, #tpu.memory_space<vmem>>, vector<16x32xbf16>
    %cst = arith.constant dense<0.000000e+00> : vector<16x32xf32>
    %2 = tpu.matmul %0, %1, %cst {dimension_numbers = #tpu.dot_dimension_numbers<[1], [0], [0], [1], [0, 0, 1, 1], [], []>} : vector<16x16xbf16>, vector<16x32xbf16>, vector<16x32xf32> -> vector<16x32xf32>
    %c0_3 = arith.constant 0 : index
    %c0_4 = arith.constant 0 : index
    %3 = vector.load %arg1[%c0_3, %c0_4] : memref<16x32xf32, #tpu.memory_space<vmem>>, vector<16x32xf32>
    %4 = arith.addf %2, %3 : vector<16x32xf32>
    %c0_5 = arith.constant 0 : index
    %c0_6 = arith.constant 0 : index
    %5 = vector.load %arg2[%c0_5, %c0_6] : memref<16x16xf32, #tpu.memory_space<vmem>>, vector<16x16xf32>
    %cst_7 = arith.constant dense<0.000000e+00> : vector<16xf32>
    %6 = vector.multi_reduction <add>, %4, %cst_7 [1] : vector<16x32xf32> to vector<16xf32>
    %7 = vector.shape_cast %6 : vector<16xf32> to vector<16x1xf32>
    %cst_8 = arith.constant 3.200000e+01 : f32
    %8 = vector.broadcast %cst_8 : f32 to vector<16x1xf32>
    %9 = arith.divf %7, %8 : vector<16x1xf32>
    %10 = vector.broadcast %9 : vector<16x1xf32> to vector<16x32xf32>
    %11 = arith.subf %4, %10 : vector<16x32xf32>
    %12 = arith.mulf %11, %11 : vector<16x32xf32>
    %cst_9 = arith.constant dense<0.000000e+00> : vector<16xf32>
    %13 = vector.multi_reduction <add>, %12, %cst_9 [1] : vector<16x32xf32> to vector<16xf32>
    %14 = vector.shape_cast %13 : vector<16xf32> to vector<16x1xf32>
    %cst_10 = arith.constant 3.200000e+01 : f32
    %15 = vector.broadcast %cst_10 : f32 to vector<16x1xf32>
    %16 = arith.divf %14, %15 : vector<16x1xf32>
    %17 = vector.broadcast %9 : vector<16x1xf32> to vector<16x32xf32>
    %18 = arith.subf %4, %17 : vector<16x32xf32>
    %cst_11 = arith.constant 9.99999974E-6 : f32
    %19 = vector.broadcast %cst_11 : f32 to vector<16x1xf32>
    %20 = arith.addf %16, %19 : vector<16x1xf32>
    %21 = math.rsqrt %20 : vector<16x1xf32>
    %22 = vector.broadcast %21 : vector<16x1xf32> to vector<16x32xf32>
    %23 = arith.mulf %18, %22 : vector<16x32xf32>
    %24 = arith.truncf %23 : vector<16x32xf32> to vector<16x32xbf16>
    %c0_12 = arith.constant 0 : index
    %c0_13 = arith.constant 0 : index
    %c0_14 = arith.constant 0 : index
    %25 = vector.load %arg4[%c0_12, %c0_13, %c0_14] : memref<2x32x96xbf16, #tpu.memory_space<vmem>>, vector<1x32x96xbf16>
    %26 = vector.shape_cast %25 : vector<1x32x96xbf16> to vector<32x96xbf16>
    %cst_15 = arith.constant dense<0.000000e+00> : vector<16x96xf32>
    %27 = tpu.matmul %24, %26, %cst_15 {dimension_numbers = #tpu.dot_dimension_numbers<[1], [0], [0], [1], [0, 0, 1, 1], [], []>} : vector<16x32xbf16>, vector<32x96xbf16>, vector<16x96xf32> -> vector<16x96xf32>
    %c0_16 = arith.constant 0 : index
    %c0_17 = arith.constant 0 : index
    %c0_18 = arith.constant 0 : index
    %28 = vector.load %arg5[%c0_16, %c0_17, %c0_18] : memref<2x1x96xf32, #tpu.memory_space<vmem>>, vector<1x1x96xf32>
    %29 = vector.shape_cast %28 : vector<1x1x96xf32> to vector<1x96xf32>
    %30 = vector.broadcast %29 : vector<1x96xf32> to vector<16x96xf32>
    %31 = arith.addf %27, %30 : vector<16x96xf32>
    %32 = arith.truncf %31 : vector<16x96xf32> to vector<16x96xbf16>
    %33 = vector.extract_strided_slice %32 {offsets = [0, 0], sizes = [16, 16], strides = [1, 1]} : vector<16x96xbf16> to vector<16x16xbf16>
    %34 = vector.extract_strided_slice %32 {offsets = [0, 32], sizes = [16, 16], strides = [1, 1]} : vector<16x96xbf16> to vector<16x16xbf16>
    %35 = vector.extract_strided_slice %32 {offsets = [0, 64], sizes = [16, 16], strides = [1, 1]} : vector<16x96xbf16> to vector<16x16xbf16>
    "tpu.trace_start"() <{level = 10 : i32, message = "nc,mc->nm"}> : () -> ()
    %cst_19 = arith.constant dense<0.000000e+00> : vector<16x16xf32>
    %36 = tpu.matmul %33, %34, %cst_19 {dimension_numbers = #tpu.dot_dimension_numbers<[1], [1], [0], [0], [0, 0, 1, 0], [], []>} : vector<16x16xbf16>, vector<16x16xbf16>, vector<16x16xf32> -> vector<16x16xf32>
    "tpu.trace_stop"() : () -> ()
    %37 = arith.addf %36, %5 : vector<16x16xf32>
    %cst_20 = arith.constant dense<0xFF800000> : vector<16xf32>
    %38 = vector.multi_reduction <maximumf>, %37, %cst_20 [1] : vector<16x16xf32> to vector<16xf32>
    %39 = vector.shape_cast %38 : vector<16xf32> to vector<16x1xf32>
    %40 = vector.broadcast %39 : vector<16x1xf32> to vector<16x16xf32>
    %41 = arith.subf %37, %40 : vector<16x16xf32>
    %42 = math.exp %41 : vector<16x16xf32>
    %cst_21 = arith.constant dense<0.000000e+00> : vector<16xf32>
    %43 = vector.multi_reduction <add>, %42, %cst_21 [1] : vector<16x16xf32> to vector<16xf32>
    %44 = vector.shape_cast %43 : vector<16xf32> to vector<16x1xf32>
    %45 = tpu.reciprocal %44 {approx = true} : vector<16x1xf32> -> vector<16x1xf32>
    %46 = vector.broadcast %45 : vector<16x1xf32> to vector<16x16xf32>
    %47 = arith.mulf %42, %46 : vector<16x16xf32>
    %48 = arith.truncf %47 : vector<16x16xf32> to vector<16x16xbf16>
    %cst_22 = arith.constant dense<0.000000e+00> : vector<16x16xf32>
    %49 = tpu.matmul %48, %35, %cst_22 {dimension_numbers = #tpu.dot_dimension_numbers<[1], [0], [0], [1], [0, 0, 1, 1], [], []>} : vector<16x16xbf16>, vector<16x16xbf16>, vector<16x16xf32> -> vector<16x16xf32>
    %50 = vector.extract_strided_slice %32 {offsets = [0, 16], sizes = [16, 16], strides = [1, 1]} : vector<16x96xbf16> to vector<16x16xbf16>
    %51 = vector.extract_strided_slice %32 {offsets = [0, 48], sizes = [16, 16], strides = [1, 1]} : vector<16x96xbf16> to vector<16x16xbf16>
    %52 = vector.extract_strided_slice %32 {offsets = [0, 80], sizes = [16, 16], strides = [1, 1]} : vector<16x96xbf16> to vector<16x16xbf16>
    "tpu.trace_start"() <{level = 10 : i32, message = "nc,mc->nm"}> : () -> ()
    %cst_23 = arith.constant dense<0.000000e+00> : vector<16x16xf32>
    %53 = tpu.matmul %50, %51, %cst_23 {dimension_numbers = #tpu.dot_dimension_numbers<[1], [1], [0], [0], [0, 0, 1, 0], [], []>} : vector<16x16xbf16>, vector<16x16xbf16>, vector<16x16xf32> -> vector<16x16xf32>
    "tpu.trace_stop"() : () -> ()
    %54 = arith.addf %53, %5 : vector<16x16xf32>
    %cst_24 = arith.constant dense<0xFF800000> : vector<16xf32>
    %55 = vector.multi_reduction <maximumf>, %54, %cst_24 [1] : vector<16x16xf32> to vector<16xf32>
    %56 = vector.shape_cast %55 : vector<16xf32> to vector<16x1xf32>
    %57 = vector.broadcast %56 : vector<16x1xf32> to vector<16x16xf32>
    %58 = arith.subf %54, %57 : vector<16x16xf32>
    %59 = math.exp %58 : vector<16x16xf32>
    %cst_25 = arith.constant dense<0.000000e+00> : vector<16xf32>
    %60 = vector.multi_reduction <add>, %59, %cst_25 [1] : vector<16x16xf32> to vector<16xf32>
    %61 = vector.shape_cast %60 : vector<16xf32> to vector<16x1xf32>
    %62 = tpu.reciprocal %61 {approx = true} : vector<16x1xf32> -> vector<16x1xf32>
    %63 = vector.broadcast %62 : vector<16x1xf32> to vector<16x16xf32>
    %64 = arith.mulf %59, %63 : vector<16x16xf32>
    %65 = arith.truncf %64 : vector<16x16xf32> to vector<16x16xbf16>
    %cst_26 = arith.constant dense<0.000000e+00> : vector<16x16xf32>
    %66 = tpu.matmul %65, %52, %cst_26 {dimension_numbers = #tpu.dot_dimension_numbers<[1], [0], [0], [1], [0, 0, 1, 1], [], []>} : vector<16x16xbf16>, vector<16x16xbf16>, vector<16x16xf32> -> vector<16x16xf32>
    %67 = tpu.concatenate %49, %66 in 1 : vector<16x16xf32>, vector<16x16xf32> -> vector<16x32xf32>
    %68 = arith.truncf %67 : vector<16x32xf32> to vector<16x32xbf16>
    %c0_27 = arith.constant 0 : index
    %c0_28 = arith.constant 0 : index
    %c0_29 = arith.constant 0 : index
    %69 = vector.load %arg6[%c0_27, %c0_28, %c0_29] : memref<2x32x32xbf16, #tpu.memory_space<vmem>>, vector<1x32x32xbf16>
    %70 = vector.shape_cast %69 : vector<1x32x32xbf16> to vector<32x32xbf16>
    %cst_30 = arith.constant dense<0.000000e+00> : vector<16x32xf32>
    %71 = tpu.matmul %68, %70, %cst_30 {dimension_numbers = #tpu.dot_dimension_numbers<[1], [0], [0], [1], [0, 0, 1, 1], [], []>} : vector<16x32xbf16>, vector<32x32xbf16>, vector<16x32xf32> -> vector<16x32xf32>
    %72 = arith.addf %4, %71 : vector<16x32xf32>
    %c0_31 = arith.constant 0 : index
    %c0_32 = arith.constant 0 : index
    %c0_33 = arith.constant 0 : index
    %73 = vector.load %arg7[%c0_31, %c0_32, %c0_33] : memref<2x1x32xf32, #tpu.memory_space<vmem>>, vector<1x1x32xf32>
    %74 = vector.shape_cast %73 : vector<1x1x32xf32> to vector<1x32xf32>
    %75 = vector.broadcast %74 : vector<1x32xf32> to vector<16x32xf32>
    %76 = arith.addf %72, %75 : vector<16x32xf32>
    %cst_34 = arith.constant dense<0.000000e+00> : vector<16xf32>
    %77 = vector.multi_reduction <add>, %76, %cst_34 [1] : vector<16x32xf32> to vector<16xf32>
    %78 = vector.shape_cast %77 : vector<16xf32> to vector<16x1xf32>
    %cst_35 = arith.constant 3.200000e+01 : f32
    %79 = vector.broadcast %cst_35 : f32 to vector<16x1xf32>
    %80 = arith.divf %78, %79 : vector<16x1xf32>
    %81 = vector.broadcast %80 : vector<16x1xf32> to vector<16x32xf32>
    %82 = arith.subf %76, %81 : vector<16x32xf32>
    %83 = arith.mulf %82, %82 : vector<16x32xf32>
    %cst_36 = arith.constant dense<0.000000e+00> : vector<16xf32>
    %84 = vector.multi_reduction <add>, %83, %cst_36 [1] : vector<16x32xf32> to vector<16xf32>
    %85 = vector.shape_cast %84 : vector<16xf32> to vector<16x1xf32>
    %cst_37 = arith.constant 3.200000e+01 : f32
    %86 = vector.broadcast %cst_37 : f32 to vector<16x1xf32>
    %87 = arith.divf %85, %86 : vector<16x1xf32>
    %88 = vector.broadcast %80 : vector<16x1xf32> to vector<16x32xf32>
    %89 = arith.subf %76, %88 : vector<16x32xf32>
    %cst_38 = arith.constant 9.99999974E-6 : f32
    %90 = vector.broadcast %cst_38 : f32 to vector<16x1xf32>
    %91 = arith.addf %87, %90 : vector<16x1xf32>
    %92 = math.rsqrt %91 : vector<16x1xf32>
    %93 = vector.broadcast %92 : vector<16x1xf32> to vector<16x32xf32>
    %94 = arith.mulf %89, %93 : vector<16x32xf32>
    %95 = arith.truncf %94 : vector<16x32xf32> to vector<16x32xbf16>
    %c0_39 = arith.constant 0 : index
    %c0_40 = arith.constant 0 : index
    %c0_41 = arith.constant 0 : index
    %96 = vector.load %arg8[%c0_39, %c0_40, %c0_41] : memref<2x32x64xbf16, #tpu.memory_space<vmem>>, vector<1x32x64xbf16>
    %97 = vector.shape_cast %96 : vector<1x32x64xbf16> to vector<32x64xbf16>
    %cst_42 = arith.constant dense<0.000000e+00> : vector<16x64xf32>
    %98 = tpu.matmul %95, %97, %cst_42 {dimension_numbers = #tpu.dot_dimension_numbers<[1], [0], [0], [1], [0, 0, 1, 1], [], []>} : vector<16x32xbf16>, vector<32x64xbf16>, vector<16x64xf32> -> vector<16x64xf32>
    %c0_43 = arith.constant 0 : index
    %c0_44 = arith.constant 0 : index
    %c0_45 = arith.constant 0 : index
    %99 = vector.load %arg9[%c0_43, %c0_44, %c0_45] : memref<2x1x64xf32, #tpu.memory_space<vmem>>, vector<1x1x64xf32>
    %100 = vector.shape_cast %99 : vector<1x1x64xf32> to vector<1x64xf32>
    %101 = vector.broadcast %100 : vector<1x64xf32> to vector<16x64xf32>
    %102 = arith.addf %98, %101 : vector<16x64xf32>
    %cst_46 = arith.constant 0.000000e+00 : f32
    %103 = vector.broadcast %cst_46 : f32 to vector<16x64xf32>
    %104 = arith.maximumf %102, %103 : vector<16x64xf32>
    %105 = arith.truncf %104 : vector<16x64xf32> to vector<16x64xbf16>
    %c0_47 = arith.constant 0 : index
    %c0_48 = arith.constant 0 : index
    %c0_49 = arith.constant 0 : index
    %106 = vector.load %arg10[%c0_47, %c0_48, %c0_49] : memref<2x64x32xbf16, #tpu.memory_space<vmem>>, vector<1x64x32xbf16>
    %107 = vector.shape_cast %106 : vector<1x64x32xbf16> to vector<64x32xbf16>
    %cst_50 = arith.constant dense<0.000000e+00> : vector<16x32xf32>
    %108 = tpu.matmul %105, %107, %cst_50 {dimension_numbers = #tpu.dot_dimension_numbers<[1], [0], [0], [1], [0, 0, 1, 1], [], []>} : vector<16x64xbf16>, vector<64x32xbf16>, vector<16x32xf32> -> vector<16x32xf32>
    %109 = arith.addf %76, %108 : vector<16x32xf32>
    %c0_51 = arith.constant 0 : index
    %c0_52 = arith.constant 0 : index
    %c0_53 = arith.constant 0 : index
    %110 = vector.load %arg11[%c0_51, %c0_52, %c0_53] : memref<2x1x32xf32, #tpu.memory_space<vmem>>, vector<1x1x32xf32>
    %111 = vector.shape_cast %110 : vector<1x1x32xf32> to vector<1x32xf32>
    %112 = vector.broadcast %111 : vector<1x32xf32> to vector<16x32xf32>
    %113 = arith.addf %109, %112 : vector<16x32xf32>
    %cst_54 = arith.constant dense<0.000000e+00> : vector<16xf32>
    %114 = vector.multi_reduction <add>, %113, %cst_54 [1] : vector<16x32xf32> to vector<16xf32>
    %115 = vector.shape_cast %114 : vector<16xf32> to vector<16x1xf32>
    %cst_55 = arith.constant 3.200000e+01 : f32
    %116 = vector.broadcast %cst_55 : f32 to vector<16x1xf32>
    %117 = arith.divf %115, %116 : vector<16x1xf32>
    %118 = vector.broadcast %117 : vector<16x1xf32> to vector<16x32xf32>
    %119 = arith.subf %113, %118 : vector<16x32xf32>
    %120 = arith.mulf %119, %119 : vector<16x32xf32>
    %cst_56 = arith.constant dense<0.000000e+00> : vector<16xf32>
    %121 = vector.multi_reduction <add>, %120, %cst_56 [1] : vector<16x32xf32> to vector<16xf32>
    %122 = vector.shape_cast %121 : vector<16xf32> to vector<16x1xf32>
    %cst_57 = arith.constant 3.200000e+01 : f32
    %123 = vector.broadcast %cst_57 : f32 to vector<16x1xf32>
    %124 = arith.divf %122, %123 : vector<16x1xf32>
    %125 = vector.broadcast %117 : vector<16x1xf32> to vector<16x32xf32>
    %126 = arith.subf %113, %125 : vector<16x32xf32>
    %cst_58 = arith.constant 9.99999974E-6 : f32
    %127 = vector.broadcast %cst_58 : f32 to vector<16x1xf32>
    %128 = arith.addf %124, %127 : vector<16x1xf32>
    %129 = math.rsqrt %128 : vector<16x1xf32>
    %130 = vector.broadcast %129 : vector<16x1xf32> to vector<16x32xf32>
    %131 = arith.mulf %126, %130 : vector<16x32xf32>
    %132 = arith.truncf %131 : vector<16x32xf32> to vector<16x32xbf16>
    %c1 = arith.constant 1 : index
    %c0_59 = arith.constant 0 : index
    %c0_60 = arith.constant 0 : index
    %133 = vector.load %arg4[%c1, %c0_59, %c0_60] : memref<2x32x96xbf16, #tpu.memory_space<vmem>>, vector<1x32x96xbf16>
    %134 = vector.shape_cast %133 : vector<1x32x96xbf16> to vector<32x96xbf16>
    %cst_61 = arith.constant dense<0.000000e+00> : vector<16x96xf32>
    %135 = tpu.matmul %132, %134, %cst_61 {dimension_numbers = #tpu.dot_dimension_numbers<[1], [0], [0], [1], [0, 0, 1, 1], [], []>} : vector<16x32xbf16>, vector<32x96xbf16>, vector<16x96xf32> -> vector<16x96xf32>
    %c1_62 = arith.constant 1 : index
    %c0_63 = arith.constant 0 : index
    %c0_64 = arith.constant 0 : index
    %136 = vector.load %arg5[%c1_62, %c0_63, %c0_64] : memref<2x1x96xf32, #tpu.memory_space<vmem>>, vector<1x1x96xf32>
    %137 = vector.shape_cast %136 : vector<1x1x96xf32> to vector<1x96xf32>
    %138 = vector.broadcast %137 : vector<1x96xf32> to vector<16x96xf32>
    %139 = arith.addf %135, %138 : vector<16x96xf32>
    %140 = arith.truncf %139 : vector<16x96xf32> to vector<16x96xbf16>
    %141 = vector.extract_strided_slice %140 {offsets = [0, 0], sizes = [16, 16], strides = [1, 1]} : vector<16x96xbf16> to vector<16x16xbf16>
    %142 = vector.extract_strided_slice %140 {offsets = [0, 32], sizes = [16, 16], strides = [1, 1]} : vector<16x96xbf16> to vector<16x16xbf16>
    %143 = vector.extract_strided_slice %140 {offsets = [0, 64], sizes = [16, 16], strides = [1, 1]} : vector<16x96xbf16> to vector<16x16xbf16>
    "tpu.trace_start"() <{level = 10 : i32, message = "nc,mc->nm"}> : () -> ()
    %cst_65 = arith.constant dense<0.000000e+00> : vector<16x16xf32>
    %144 = tpu.matmul %141, %142, %cst_65 {dimension_numbers = #tpu.dot_dimension_numbers<[1], [1], [0], [0], [0, 0, 1, 0], [], []>} : vector<16x16xbf16>, vector<16x16xbf16>, vector<16x16xf32> -> vector<16x16xf32>
    "tpu.trace_stop"() : () -> ()
    %145 = arith.addf %144, %5 : vector<16x16xf32>
    %cst_66 = arith.constant dense<0xFF800000> : vector<16xf32>
    %146 = vector.multi_reduction <maximumf>, %145, %cst_66 [1] : vector<16x16xf32> to vector<16xf32>
    %147 = vector.shape_cast %146 : vector<16xf32> to vector<16x1xf32>
    %148 = vector.broadcast %147 : vector<16x1xf32> to vector<16x16xf32>
    %149 = arith.subf %145, %148 : vector<16x16xf32>
    %150 = math.exp %149 : vector<16x16xf32>
    %cst_67 = arith.constant dense<0.000000e+00> : vector<16xf32>
    %151 = vector.multi_reduction <add>, %150, %cst_67 [1] : vector<16x16xf32> to vector<16xf32>
    %152 = vector.shape_cast %151 : vector<16xf32> to vector<16x1xf32>
    %153 = tpu.reciprocal %152 {approx = true} : vector<16x1xf32> -> vector<16x1xf32>
    %154 = vector.broadcast %153 : vector<16x1xf32> to vector<16x16xf32>
    %155 = arith.mulf %150, %154 : vector<16x16xf32>
    %156 = arith.truncf %155 : vector<16x16xf32> to vector<16x16xbf16>
    %cst_68 = arith.constant dense<0.000000e+00> : vector<16x16xf32>
    %157 = tpu.matmul %156, %143, %cst_68 {dimension_numbers = #tpu.dot_dimension_numbers<[1], [0], [0], [1], [0, 0, 1, 1], [], []>} : vector<16x16xbf16>, vector<16x16xbf16>, vector<16x16xf32> -> vector<16x16xf32>
    %158 = vector.extract_strided_slice %140 {offsets = [0, 16], sizes = [16, 16], strides = [1, 1]} : vector<16x96xbf16> to vector<16x16xbf16>
    %159 = vector.extract_strided_slice %140 {offsets = [0, 48], sizes = [16, 16], strides = [1, 1]} : vector<16x96xbf16> to vector<16x16xbf16>
    %160 = vector.extract_strided_slice %140 {offsets = [0, 80], sizes = [16, 16], strides = [1, 1]} : vector<16x96xbf16> to vector<16x16xbf16>
    "tpu.trace_start"() <{level = 10 : i32, message = "nc,mc->nm"}> : () -> ()
    %cst_69 = arith.constant dense<0.000000e+00> : vector<16x16xf32>
    %161 = tpu.matmul %158, %159, %cst_69 {dimension_numbers = #tpu.dot_dimension_numbers<[1], [1], [0], [0], [0, 0, 1, 0], [], []>} : vector<16x16xbf16>, vector<16x16xbf16>, vector<16x16xf32> -> vector<16x16xf32>
    "tpu.trace_stop"() : () -> ()
    %162 = arith.addf %161, %5 : vector<16x16xf32>
    %cst_70 = arith.constant dense<0xFF800000> : vector<16xf32>
    %163 = vector.multi_reduction <maximumf>, %162, %cst_70 [1] : vector<16x16xf32> to vector<16xf32>
    %164 = vector.shape_cast %163 : vector<16xf32> to vector<16x1xf32>
    %165 = vector.broadcast %164 : vector<16x1xf32> to vector<16x16xf32>
    %166 = arith.subf %162, %165 : vector<16x16xf32>
    %167 = math.exp %166 : vector<16x16xf32>
    %cst_71 = arith.constant dense<0.000000e+00> : vector<16xf32>
    %168 = vector.multi_reduction <add>, %167, %cst_71 [1] : vector<16x16xf32> to vector<16xf32>
    %169 = vector.shape_cast %168 : vector<16xf32> to vector<16x1xf32>
    %170 = tpu.reciprocal %169 {approx = true} : vector<16x1xf32> -> vector<16x1xf32>
    %171 = vector.broadcast %170 : vector<16x1xf32> to vector<16x16xf32>
    %172 = arith.mulf %167, %171 : vector<16x16xf32>
    %173 = arith.truncf %172 : vector<16x16xf32> to vector<16x16xbf16>
    %cst_72 = arith.constant dense<0.000000e+00> : vector<16x16xf32>
    %174 = tpu.matmul %173, %160, %cst_72 {dimension_numbers = #tpu.dot_dimension_numbers<[1], [0], [0], [1], [0, 0, 1, 1], [], []>} : vector<16x16xbf16>, vector<16x16xbf16>, vector<16x16xf32> -> vector<16x16xf32>
    %175 = tpu.concatenate %157, %174 in 1 : vector<16x16xf32>, vector<16x16xf32> -> vector<16x32xf32>
    %176 = arith.truncf %175 : vector<16x32xf32> to vector<16x32xbf16>
    %c1_73 = arith.constant 1 : index
    %c0_74 = arith.constant 0 : index
    %c0_75 = arith.constant 0 : index
    %177 = vector.load %arg6[%c1_73, %c0_74, %c0_75] : memref<2x32x32xbf16, #tpu.memory_space<vmem>>, vector<1x32x32xbf16>
    %178 = vector.shape_cast %177 : vector<1x32x32xbf16> to vector<32x32xbf16>
    %cst_76 = arith.constant dense<0.000000e+00> : vector<16x32xf32>
    %179 = tpu.matmul %176, %178, %cst_76 {dimension_numbers = #tpu.dot_dimension_numbers<[1], [0], [0], [1], [0, 0, 1, 1], [], []>} : vector<16x32xbf16>, vector<32x32xbf16>, vector<16x32xf32> -> vector<16x32xf32>
    %180 = arith.addf %113, %179 : vector<16x32xf32>
    %c1_77 = arith.constant 1 : index
    %c0_78 = arith.constant 0 : index
    %c0_79 = arith.constant 0 : index
    %181 = vector.load %arg7[%c1_77, %c0_78, %c0_79] : memref<2x1x32xf32, #tpu.memory_space<vmem>>, vector<1x1x32xf32>
    %182 = vector.shape_cast %181 : vector<1x1x32xf32> to vector<1x32xf32>
    %183 = vector.broadcast %182 : vector<1x32xf32> to vector<16x32xf32>
    %184 = arith.addf %180, %183 : vector<16x32xf32>
    %cst_80 = arith.constant dense<0.000000e+00> : vector<16xf32>
    %185 = vector.multi_reduction <add>, %184, %cst_80 [1] : vector<16x32xf32> to vector<16xf32>
    %186 = vector.shape_cast %185 : vector<16xf32> to vector<16x1xf32>
    %cst_81 = arith.constant 3.200000e+01 : f32
    %187 = vector.broadcast %cst_81 : f32 to vector<16x1xf32>
    %188 = arith.divf %186, %187 : vector<16x1xf32>
    %189 = vector.broadcast %188 : vector<16x1xf32> to vector<16x32xf32>
    %190 = arith.subf %184, %189 : vector<16x32xf32>
    %191 = arith.mulf %190, %190 : vector<16x32xf32>
    %cst_82 = arith.constant dense<0.000000e+00> : vector<16xf32>
    %192 = vector.multi_reduction <add>, %191, %cst_82 [1] : vector<16x32xf32> to vector<16xf32>
    %193 = vector.shape_cast %192 : vector<16xf32> to vector<16x1xf32>
    %cst_83 = arith.constant 3.200000e+01 : f32
    %194 = vector.broadcast %cst_83 : f32 to vector<16x1xf32>
    %195 = arith.divf %193, %194 : vector<16x1xf32>
    %196 = vector.broadcast %188 : vector<16x1xf32> to vector<16x32xf32>
    %197 = arith.subf %184, %196 : vector<16x32xf32>
    %cst_84 = arith.constant 9.99999974E-6 : f32
    %198 = vector.broadcast %cst_84 : f32 to vector<16x1xf32>
    %199 = arith.addf %195, %198 : vector<16x1xf32>
    %200 = math.rsqrt %199 : vector<16x1xf32>
    %201 = vector.broadcast %200 : vector<16x1xf32> to vector<16x32xf32>
    %202 = arith.mulf %197, %201 : vector<16x32xf32>
    %203 = arith.truncf %202 : vector<16x32xf32> to vector<16x32xbf16>
    %c1_85 = arith.constant 1 : index
    %c0_86 = arith.constant 0 : index
    %c0_87 = arith.constant 0 : index
    %204 = vector.load %arg8[%c1_85, %c0_86, %c0_87] : memref<2x32x64xbf16, #tpu.memory_space<vmem>>, vector<1x32x64xbf16>
    %205 = vector.shape_cast %204 : vector<1x32x64xbf16> to vector<32x64xbf16>
    %cst_88 = arith.constant dense<0.000000e+00> : vector<16x64xf32>
    %206 = tpu.matmul %203, %205, %cst_88 {dimension_numbers = #tpu.dot_dimension_numbers<[1], [0], [0], [1], [0, 0, 1, 1], [], []>} : vector<16x32xbf16>, vector<32x64xbf16>, vector<16x64xf32> -> vector<16x64xf32>
    %c1_89 = arith.constant 1 : index
    %c0_90 = arith.constant 0 : index
    %c0_91 = arith.constant 0 : index
    %207 = vector.load %arg9[%c1_89, %c0_90, %c0_91] : memref<2x1x64xf32, #tpu.memory_space<vmem>>, vector<1x1x64xf32>
    %208 = vector.shape_cast %207 : vector<1x1x64xf32> to vector<1x64xf32>
    %209 = vector.broadcast %208 : vector<1x64xf32> to vector<16x64xf32>
    %210 = arith.addf %206, %209 : vector<16x64xf32>
    %cst_92 = arith.constant 0.000000e+00 : f32
    %211 = vector.broadcast %cst_92 : f32 to vector<16x64xf32>
    %212 = arith.maximumf %210, %211 : vector<16x64xf32>
    %213 = arith.truncf %212 : vector<16x64xf32> to vector<16x64xbf16>
    %c1_93 = arith.constant 1 : index
    %c0_94 = arith.constant 0 : index
    %c0_95 = arith.constant 0 : index
    %214 = vector.load %arg10[%c1_93, %c0_94, %c0_95] : memref<2x64x32xbf16, #tpu.memory_space<vmem>>, vector<1x64x32xbf16>
    %215 = vector.shape_cast %214 : vector<1x64x32xbf16> to vector<64x32xbf16>
    %cst_96 = arith.constant dense<0.000000e+00> : vector<16x32xf32>
    %216 = tpu.matmul %213, %215, %cst_96 {dimension_numbers = #tpu.dot_dimension_numbers<[1], [0], [0], [1], [0, 0, 1, 1], [], []>} : vector<16x64xbf16>, vector<64x32xbf16>, vector<16x32xf32> -> vector<16x32xf32>
    %217 = arith.addf %184, %216 : vector<16x32xf32>
    %c1_97 = arith.constant 1 : index
    %c0_98 = arith.constant 0 : index
    %c0_99 = arith.constant 0 : index
    %218 = vector.load %arg11[%c1_97, %c0_98, %c0_99] : memref<2x1x32xf32, #tpu.memory_space<vmem>>, vector<1x1x32xf32>
    %219 = vector.shape_cast %218 : vector<1x1x32xf32> to vector<1x32xf32>
    %220 = vector.broadcast %219 : vector<1x32xf32> to vector<16x32xf32>
    %221 = arith.addf %217, %220 : vector<16x32xf32>
    %222 = arith.truncf %221 : vector<16x32xf32> to vector<16x32xbf16>
    %c0_100 = arith.constant 0 : index
    %c0_101 = arith.constant 0 : index
    %223 = vector.load %arg12[%c0_100, %c0_101] : memref<32x4xbf16, #tpu.memory_space<vmem>>, vector<32x4xbf16>
    %cst_102 = arith.constant dense<0.000000e+00> : vector<16x4xf32>
    %224 = tpu.matmul %222, %223, %cst_102 {dimension_numbers = #tpu.dot_dimension_numbers<[1], [0], [0], [1], [0, 0, 1, 1], [], []>} : vector<16x32xbf16>, vector<32x4xbf16>, vector<16x4xf32> -> vector<16x4xf32>
    %c0_103 = arith.constant 0 : index
    %c0_104 = arith.constant 0 : index
    %225 = vector.load %arg13[%c0_103, %c0_104] : memref<1x4xf32, #tpu.memory_space<vmem>>, vector<1x4xf32>
    %226 = vector.broadcast %225 : vector<1x4xf32> to vector<16x4xf32>
    %227 = arith.addf %224, %226 : vector<16x4xf32>
    %c0_105 = arith.constant 0 : index
    %c0_106 = arith.constant 0 : index
    %228 = vector.load %arg14[%c0_105, %c0_106] : memref<16x4xf32, #tpu.memory_space<vmem>>, vector<16x4xf32>
    tpu.vector_store %arg14[%c0_105, %c0_106], %227 {strides = array<i32>} : memref<16x4xf32, #tpu.memory_space<vmem>>, vector<16x4xf32>,
    return
  }
}

</mosaic_0001>

<bundles_post_ra>
// kernel: eq.8
= control target key start
LH: loop header
LB: loop body
LE: loop exit
PB: predicated region body
PF: predicated region fallthrough
CT: control target
= control target key end

     0   :  { %vm7_vm0 = vcmask 64512   ;;  %vm13_vm1 = vcmask 130112   ;;  %s39_s0 = inlined_call_operand.vmem [shape: s32[2,8], index: 0, kind: input, shape index: {}]   ;;  %s40_s1 = inlined_call_operand.vmem [shape: s32[16], index: 1, kind: output, shape index: {}]  }
   0x1   :  { %v4_v0 = vld [vmem:[%s39_s0] sm:$0x3]  ;;  %s22_s0 = smov 8  }
   0x2   :  { %5 = vst [vmem:[#allocation1] sm:$0x3] %v4_v0 }
   0x9   :  { %v10_v1 = vld [vmem:[#allocation1 + $0x1] sm:$0x1]   ;;  %v6_v2 = vld [vmem:[#allocation1] sm:$0x1]  }
   0xa   :  { %11 = vrot.lane.b32.xlu0 %v10_v1, %s22_s0  ;;  %8 = vst.msk [vmem:[#allocation0] sm:$0x1] %vm7_vm0, %v6_v2  }
  0x7c   :  { %v12_v3 = vpop.permute.xlu0 %11  }
  0x7d   :  { %14 = vst.msk [vmem:[#allocation0] sm:$0x1] %vm13_vm1, %v12_v3  }
  0x84   :  { %v18_v4 = vld [vmem:[#allocation0] sm:$0x1] }
  0x85   :  { %20 = vst [vmem:[%s40_s1] sm:$0x1] %v18_v4 }

// kernel: transformer_model_forward.1
= control target key start
LH: loop header
LB: loop body
LE: loop exit
PB: predicated region body
PF: predicated region fallthrough
CT: control target
= control target key end

     0   :  { %v1750_v0 = vmov 0.0   ;;  %vm1751_vm0 = vmmov 0   ;;  %vm65_vm1 = vcmask 130048   ;;  %vm112_vm2 = vcmask 261120   ;;  %s1752_s24 = smov 80   ;;  %s1753_s25 = smov 96   ;;  %s2155_s3 = inlined_call_operand.vmem [shape: bf16[16,32], index: 3, kind: input, shape index: {}]   ;;  %s2156_s0 = inlined_call_operand.vmem [shape: bf16[16,16], index: 0, kind: input, shape index: {}]   ;;  %s2157_s1 = inlined_call_operand.vmem [shape: f32[16,32], index: 1, kind: input, shape index: {}]   ;;  %s2158_s4 = inlined_call_operand.vmem [shape: bf16[2,32,96], index: 4, kind: input, shape index: {}]   ;;  %s2159_s5 = inlined_call_operand.vmem [shape: f32[2,1,96], index: 5, kind: input, shape index: {}]   ;;  %s2160_s2 = inlined_call_operand.vmem [shape: f32[16,16], index: 2, kind: input, shape index: {}]   ;;  %s2161_s6 = inlined_call_operand.vmem [shape: bf16[2,32,32], index: 6, kind: input, shape index: {}]   ;;  %s2162_s7 = inlined_call_operand.vmem [shape: f32[2,1,32], index: 7, kind: input, shape index: {}]   ;;  %s2163_s8 = inlined_call_operand.vmem [shape: bf16[2,32,64], index: 8, kind: input, shape index: {}]   ;;  %s2164_s10 = inlined_call_operand.vmem [shape: bf16[2,64,32], index: 10, kind: input, shape index: {}]   ;;  %s2165_s9 = inlined_call_operand.vmem [shape: f32[2,1,64], index: 9, kind: input, shape index: {}]   ;;  %s2166_s11 = inlined_call_operand.vmem [shape: f32[2,1,32], index: 11, kind: input, shape index: {}]   ;;  %s2167_s12 = inlined_call_operand.vmem [shape: bf16[32,4], index: 12, kind: input, shape index: {}]   ;;  %s2168_s13 = inlined_call_operand.vmem [shape: f32[1,4], index: 13, kind: input, shape index: {}]   ;;  %s2169_s14 = inlined_call_operand.vmem [shape: f32[16,4], index: 14, kind: output, shape index: {}]  }
   0x1   :  { %1526 = vmatprep.subr.bf16.mxu0 %v1750_v0  ;;  %v1678_v1 = vld [vmem:[%s2155_s3] sm:$0xff]   ;;  %1528 = vmatprep.mubr.msk.bf16.mxu0 %vm1751_vm0, %v1750_v0  ;;  %v53_v5 = vld [vmem:[%s2157_s1 + $0x8] sm:$0xff]  ;;  %s1754_s26 = smov 112   ;;  %s1756_s15 = smov 48   ;;  %vm661_vm3 = vcmask 523264   ;;  %vm1395_vm4 = vcmask 31744  }
   0x2   :  { %v1679_v2 = vld [vmem:[%s2156_s0] sm:$0xff]   ;;  %1532 = vmatprep.subr.bf16.mxu1 %v1750_v0  ;;  %1536 = vmatprep.mubr.msk.bf16.mxu1 %vm1751_vm0, %v1750_v0  ;;  %v1681_v24 = vld [vmem:[%s2158_s4 + $0x8] sm:$0xff]   ;;  %s1757_s18 = smov 16  }
   0x3   :  { %1527 = vmatpush3.bf16.msra.mxu0 %v1678_v1  ;;  %v52_v3 = vld [vmem:[%s2157_s1] sm:$0xff]  ;;  %v1908_v51 = vld [vmem:[%s2160_s2 + $0x8] sm:$0xff] }
   0x4   :  { %1540 = vmatprep.subr.bf16.mxu0 %v1750_v0  ;;  %v1680_v23 = vld [vmem:[%s2158_s4] sm:$0xff]  }
   0x5   :  { %1533 = vmatpush3.bf16.msra.mxu1 %v1680_v23  ;;  %v1405_v36 = vld [vmem:[%s2159_s5] ss:$0 sm:$0xff] }
   0x6   :  { %1529 = vmatmul.mubr.msk.bf16.vlgmr.msra.gmra.mrb[0].mxu0 %vm65_vm1, %v1679_v2  ;;  %1534 = vmatprep.subr.bf16.mxu1 %v1750_v0  ;;  %v1903_v49 = vld [vmem:[%s2160_s2] sm:$0xff]  ;;  %s1755_s2 = smov 64  }
   0x7   :  { %1542 = vmatprep.mubr.msk.bf16.mxu0 %vm1751_vm0, %v1750_v0 }
   0x9   :  { %1535 = vmatpush3.bf16.msra.mxu1 %v1681_v24 }
   0xa   :  { %1546 = vmatprep.subr.bf16.mxu1 %v1750_v0 }
  0xd9   :  { %v103_v4 = vpop.f32.mrb[0].mxu0 }
  0xda   :  { %v1855_v6 = vadd.f32 %v103_v4, %v52_v3  ;;  %v1530_v7 = vpop.f32.mrb[1].mxu0 }
  0xdb   :  { %v106_v8 = vpop.f32.mrb[2].mxu0 }
  0xdc   :  { %v1857_v9 = vadd.f32 %v106_v8, %v53_v5  ;;  %v1531_v10 = vpop.f32.mrb[3].mxu0  ;;  %v113_v11 = vsel %vm112_vm2, %v1855_v6, 0.0 }
  0xdd   :  { %114 = vadd.xlane.f32.xlu0 %v113_v11 }
  0xde   :  { %v116_v12 = vsel %vm112_vm2, %v1857_v9, 0.0 }
  0xe1   :  { %117 = vadd.xlane.f32.xlu0 %v116_v12 }
 0x16a   :  { %v115_v13 = vpop.xlane.xlu0 %114 }
 0x16b   :  { %v120_v14 = vmul.f32 0.03125, %v115_v13 }
 0x16d   :  { %v122_v15 = vsub.f32 %v1855_v6, %v120_v14 }
 0x16e   :  { %v118_v16 = vpop.xlane.xlu0 %117 }
 0x16f   :  { %v121_v17 = vmul.f32 0.03125, %v118_v16  ;;  %v124_v18 = vmul.f32 %v122_v15, %v122_v15 }
 0x171   :  { %v123_v19 = vsub.f32 %v1857_v9, %v121_v17  ;;  %v126_v20 = vsel %vm112_vm2, %v124_v18, 0.0 }
 0x172   :  { %127 = vadd.xlane.f32.xlu1 %v126_v20 }
 0x173   :  { %v125_v21 = vmul.f32 %v123_v19, %v123_v19 }
 0x175   :  { %v129_v22 = vsel %vm112_vm2, %v125_v21, 0.0 }
 0x176   :  { %130 = vadd.xlane.f32.xlu1 %v129_v22 }
 0x1ff   :  { %v128_v25 = vpop.xlane.xlu1 %127 }
 0x200   :  { %v132_v26 = vmul.f32 0.03125, %v128_v25 }
 0x202   :  { %v134_v27 = vadd.f32 1e-05, %v132_v26 }
 0x203   :  { %v131_v28 = vpop.xlane.xlu1 %130 }
 0x204   :  { %v133_v29 = vmul.f32 0.03125, %v131_v28  ;;  %1702 = vrsqrt.f32 %v134_v27 }
 0x206   :  { %v135_v30 = vadd.f32 1e-05, %v133_v29 }
 0x208   :  { %1704 = vrsqrt.f32 %v135_v30 }
 0x20e   :  { %v1703_v31 = vpop.eup %1702 }
 0x20f   :  { %v138_v33 = vmul.f32 %v1703_v31, %v122_v15 }
 0x212   :  { %v1705_v32 = vpop.eup %1704 }
 0x213   :  { %v139_v34 = vmul.f32 %v1705_v32, %v123_v19 }
 0x215   :  { %v140_v35 = vpack.c.bf16 %v139_v34, %v138_v33 }
 0x217   :  { %1537 = vmatmul.mubr.msk.bf16.vlgmr.msra.gmra.mrb[0].mxu1 %vm112_vm2, %v140_v35 }
 0x218   :  { %1548 = vmatprep.mubr.msk.bf16.mxu1 %vm1751_vm0, %v1750_v0 }
 0x2ea   :  { %v201_v37 = vpop.f32.mrb[0].mxu1 }
 0x2eb   :  { %v1538_v38 = vpop.f32.mrb[1].mxu1  ;;  %v202_v40 = vadd.f32 %v1405_v36, %v201_v37 }
 0x2ec   :  { %v204_v39 = vpop.f32.mrb[2].mxu1 }
 0x2ed   :  { %v205_v41 = vadd.f32 %v1405_v36, %v204_v39  ;;  %v1539_v42 = vpop.f32.mrb[3].mxu1 }
 0x2ee   :  { %v1682_v42 = vld [vmem:[%s2161_s6] sm:$0xff]  }
 0x2ef   :  { %v1881_v43 = vpack.c.bf16 %v205_v41, %v202_v40 }
 0x2f1   :  { %331 = vrot.lane.b32.xlu1 %v1881_v43, %s1752_s24  ;;  %210 = vrot.lane.b32.xlu0 %v1881_v43, %s1753_s25 }
 0x2f5   :  { %329 = vrot.lane.b32.xlu1 %v1881_v43, %s1754_s26 }
 0x363   :  { %v211_v44 = vpop.permute.xlu0 %210  ;;  %v332_v46 = vpop.permute.xlu1 %331 }
 0x364   :  { %v216_v45 = vsel %vm65_vm1, %v211_v44, 0  ;;  %v337_v47 = vsel %vm65_vm1, %v332_v46, 0 }
 0x365   :  { %1541 = vmatpush3.bf16.xpose.msra.mxu0 %v216_v45 }
 0x366   :  { %1552 = vmatprep.subr.bf16.mxu0 %v1750_v0 }
 0x367   :  { %v330_v48 = vpop.permute.xlu1 %329 }
 0x36c   :  { %1543 = vmatmul.mubr.msk.bf16.vlgmr.msra.gmra.mrb[4].mxu0 %vm65_vm1, %v1881_v43 }
 0x36d   :  { %1553 = vmatpush3.bf16.xpose.msra.mxu0 %v337_v47  ;;  %1554 = vmatprep.mubr.msk.bf16.mxu0 %vm1751_vm0, %v1750_v0  ;;  %v1683_v47 = vld [vmem:[%s2161_s6 + $0x8] sm:$0xff]  }
 0x36e   :  { %1564 = vmatprep.subr.bf16.mxu0 %v1750_v0 }
 0x374   :  { %1555 = vmatmul.mubr.msk.bf16.vlgmr.msra.gmra.mrb[8].mxu0 %vm65_vm1, %v330_v48 }
 0x375   :  { %1568 = vmatprep.mubr.msk.bf16.mxu0 %vm1751_vm0, %v1750_v0  ;;  %1565 = vmatpush3.bf16.msra.mxu0 %v1682_v42 }
 0x376   :  { %1566 = vmatprep.subr.bf16.mxu0 %v1750_v0 }
 0x379   :  { %1567 = vmatpush3.bf16.msra.mxu0 %v1683_v47  ;;  %v1426_v47 = vld [vmem:[%s2166_s11] ss:$0 sm:$0xff] }
 0x37a   :  { %1580 = vmatprep.subr.bf16.mxu0 %v1750_v0 }
 0x43f   :  { %v252_v50 = vpop.f32.mrb[4].mxu0 }
 0x440   :  { %v253_v52 = vadd.f32 %v252_v50, %v1903_v49  ;;  %v1544_v53 = vpop.f32.mrb[5].mxu0 }
 0x441   :  { %v255_v54 = vpop.f32.mrb[6].mxu0 }
 0x442   :  { %v256_v55 = vadd.f32 %v255_v54, %v1908_v51  ;;  %v1545_v56 = vpop.f32.mrb[7].mxu0  ;;  %v259_v57 = vsel %vm65_vm1, %v253_v52, -inf }
 0x443   :  { %260 = vmax.xlane.f32.xlu1 %v259_v57 }
 0x444   :  { %v262_v58 = vsel %vm65_vm1, %v256_v55, -inf }
 0x445   :  { %263 = vmax.xlane.f32.xlu0 %v262_v58 }
 0x447   :  { %v373_v59 = vpop.f32.mrb[8].mxu0 }
 0x448   :  { %v374_v60 = vadd.f32 %v373_v59, %v1903_v49  ;;  %v1556_v61 = vpop.f32.mrb[9].mxu0 }
 0x449   :  { %v376_v62 = vpop.f32.mrb[10].mxu0 }
 0x44a   :  { %v377_v63 = vadd.f32 %v376_v62, %v1908_v51  ;;  %v1557_v1 = vpop.f32.mrb[11].mxu0  ;;  %v380_v2 = vsel %vm65_vm1, %v374_v60, -inf  ;;  %v1416_v62 = vld [vmem:[%s2162_s7] ss:$0 sm:$0xff] }
 0x44b   :  { %381 = vmax.xlane.f32.xlu0 %v380_v2 }
 0x44c   :  { %v383_v3 = vsel %vm65_vm1, %v377_v63, -inf }
 0x44f   :  { %384 = vmax.xlane.f32.xlu0 %v383_v3 }
 0x4d0   :  { %v261_v4 = vpop.xlane.xlu1 %260 }
 0x4d1   :  { %v265_v5 = vsub.f32 %v253_v52, %v261_v4 }
 0x4d2   :  { %v264_v7 = vpop.xlane.xlu0 %263 }
 0x4d3   :  { %v267_v8 = vmul.f32 1.442695, %v265_v5  ;;  %v266_v10 = vsub.f32 %v256_v55, %v264_v7 }
 0x4d5   :  { %1706 = vpow2.f32 %v267_v8  ;;  %v269_v11 = vmul.f32 1.442695, %v266_v10 }
 0x4d7   :  { %1708 = vpow2.f32 %v269_v11 }
 0x4d8   :  { %v382_v12 = vpop.xlane.xlu0 %381 }
 0x4d9   :  { %v386_v13 = vsub.f32 %v374_v60, %v382_v12 }
 0x4db   :  { %v388_v14 = vmul.f32 1.442695, %v386_v13 }
 0x4dc   :  { %v385_v15 = vpop.xlane.xlu0 %384 }
 0x4dd   :  { %1710 = vpow2.f32 %v388_v14  ;;  %v387_v16 = vsub.f32 %v377_v63, %v385_v15 }
 0x4df   :  { %v1707_v17 = vpop.eup %1706  ;;  %v390_v18 = vmul.f32 1.442695, %v387_v16 }
 0x4e0   :  { %v271_v19 = vsel %vm65_vm1, %v1707_v17, 0.0 }
 0x4e1   :  { %v1709_v20 = vpop.eup %1708  ;;  %1712 = vpow2.f32 %v390_v18  ;;  %272 = vadd.xlane.f32.xlu1 %v271_v19  ;;  %v1684_v19 = vld [vmem:[%s2163_s8] sm:$0xff]  }
 0x4e2   :  { %v274_v21 = vsel %vm65_vm1, %v1709_v20, 0.0 }
 0x4e3   :  { %275 = vadd.xlane.f32.xlu0 %v274_v21  ;;  %v1686_v21 = vld [vmem:[%s2164_s10] sm:$0xff]  }
 0x4e7   :  { %v1711_v22 = vpop.eup %1710 }
 0x4e8   :  { %v392_v23 = vsel %vm65_vm1, %v1711_v22, 0.0 }
 0x4e9   :  { %393 = vadd.xlane.f32.xlu1 %v392_v23 }
 0x4eb   :  { %v1713_v24 = vpop.eup %1712 }
 0x4ec   :  { %v395_v25 = vsel %vm65_vm1, %v1713_v24, 0.0 }
 0x4ed   :  { %396 = vadd.xlane.f32.xlu0 %v395_v25 }
 0x4fa   :  { %282 = vrot.lane.b32.xlu1 %v1881_v43, %s1755_s2 }
 0x503   :  { %403 = vrot.lane.b32.xlu0 %v1881_v43, %s1756_s15 }
 0x56e   :  { %v273_v26 = vpop.xlane.xlu1 %272 }
 0x56f   :  { %1714 = vrcp.f32 %v273_v26 }
 0x570   :  { %v276_v27 = vpop.xlane.xlu0 %275 }
 0x571   :  { %1716 = vrcp.f32 %v276_v27 }
 0x576   :  { %v394_v28 = vpop.xlane.xlu1 %393 }
 0x577   :  { %1718 = vrcp.f32 %v394_v28 }
 0x579   :  { %v1715_v29 = vpop.eup %1714 }
 0x57a   :  { %v283_v30 = vpop.permute.xlu1 %282  ;;  %v397_v31 = vpop.xlane.xlu0 %396  ;;  %v279_v33 = vmul.f32 %v1715_v29, %v1707_v17 }
 0x57b   :  { %v1717_v32 = vpop.eup %1716  ;;  %1720 = vrcp.f32 %v397_v31  ;;  %1547 = vmatpush3.bf16.msra.mxu1 %v283_v30 }
 0x57c   :  { %v280_v34 = vmul.f32 %v1717_v32, %v1709_v20  ;;  %1558 = vmatprep.subr.bf16.mxu1 %v1750_v0  ;;  %v1685_v20 = vld [vmem:[%s2163_s8 + $0x8] sm:$0xff]  }
 0x57e   :  { %v404_v35 = vpop.permute.xlu0 %403  ;;  %v281_v36 = vpack.c.bf16 %v280_v34, %v279_v33  ;;  %v1688_v34 = vld [vmem:[%s2164_s10 + $0x10] sm:$0xff]  }
 0x580   :  { %1549 = vmatmul.mubr.msk.bf16.vlgmr.msra.gmra.mrb[4].mxu1 %vm65_vm1, %v281_v36  ;;  %v1417_v36 = vld [vmem:[%s2165_s9] ss:$0 sm:$0xff] }
 0x581   :  { %1559 = vmatpush3.bf16.msra.mxu1 %v404_v35  ;;  %1560 = vmatprep.mubr.msk.bf16.mxu1 %vm1751_vm0, %v1750_v0  ;;  %v1719_v37 = vpop.eup %1718  ;;  %v1689_v35 = vld [vmem:[%s2164_s10 + $0x18] sm:$0xff]  }
 0x582   :  { %1572 = vmatprep.subr.bf16.mxu1 %v1750_v0  ;;  %v400_v39 = vmul.f32 %v1719_v37, %v1711_v22  ;;  %v1687_v22 = vld [vmem:[%s2164_s10 + $0x8] sm:$0xff]  }
 0x585   :  { %v1721_v38 = vpop.eup %1720 }
 0x586   :  { %v401_v40 = vmul.f32 %v1721_v38, %v1713_v24 }
 0x588   :  { %v402_v41 = vpack.c.bf16 %v401_v40, %v400_v39 }
 0x58a   :  { %1561 = vmatmul.mubr.msk.bf16.vlgmr.msra.gmra.mrb[8].mxu1 %vm65_vm1, %v402_v41 }
 0x58b   :  { %1576 = vmatprep.mubr.msk.bf16.mxu1 %vm1751_vm0, %v1750_v0  ;;  %1573 = vmatpush3.bf16.msra.mxu1 %v1684_v19  ;;  %v1432_v19 = vld [vmem:[%s2159_s5 + $0x1] ss:$0 sm:$0xff] }
 0x58c   :  { %1574 = vmatprep.subr.bf16.mxu1 %v1750_v0 }
 0x58f   :  { %1575 = vmatpush3.bf16.msra.mxu1 %v1685_v20 }
 0x590   :  { %1592 = vmatprep.subr.bf16.mxu1 %v1750_v0 }
 0x653   :  { %v322_v43 = vpop.f32.mrb[4].mxu1 }
 0x654   :  { %v1550_v44 = vpop.f32.mrb[5].mxu1 }
 0x655   :  { %v325_v45 = vpop.f32.mrb[6].mxu1 }
 0x656   :  { %v1551_v46 = vpop.f32.mrb[7].mxu1 }
 0x65d   :  { %v443_v48 = vpop.f32.mrb[8].mxu1 }
 0x65e   :  { %v1562_v50 = vpop.f32.mrb[9].mxu1 }
 0x65f   :  { %v446_v52 = vpop.f32.mrb[10].mxu1 }
 0x660   :  { %v1668_v53 = vpack.i.bf16 %v446_v52, %v443_v48  ;;  %v1563_v54 = vpop.f32.mrb[11].mxu1 }
 0x662   :  { %1669 = vrot.lane.b32.xlu1 %v1668_v53, %s1757_s18 }
 0x6d4   :  { %v1670_v55 = vpop.permute.xlu1 %1669 }
 0x6d5   :  { %v1672_v56 = vunpack.i.h.bf16 %v1670_v55  ;;  %v1671_v57 = vunpack.i.l.bf16 %v1670_v55 }
 0x6d7   :  { %v459_v58 = vsel %vm65_vm1, %v325_v45, %v1672_v56  ;;  %v458_v59 = vsel %vm65_vm1, %v322_v43, %v1671_v57 }
 0x6d8   :  { %v460_v60 = vpack.c.bf16 %v459_v58, %v458_v59 }
 0x6da   :  { %1569 = vmatmul.mubr.msk.bf16.vlgmr.msra.gmra.mrb[12].mxu0 %vm112_vm2, %v460_v60 }
 0x6db   :  { %1588 = vmatprep.mubr.msk.bf16.mxu0 %vm1751_vm0, %v1750_v0  ;;  %1581 = vmatpush3.bf16.msra.mxu0 %v1686_v21 }
 0x6dc   :  { %1582 = vmatprep.subr.bf16.mxu0 %v1750_v0 }
 0x6df   :  { %1583 = vmatpush3.bf16.msra.mxu0 %v1687_v22 }
 0x6e0   :  { %1584 = vmatprep.subr.bf16.mxu0 %v1750_v0 }
 0x6e3   :  { %1585 = vmatpush3.bf16.msra.mxu0 %v1688_v34 }
 0x6e4   :  { %1586 = vmatprep.subr.bf16.mxu0 %v1750_v0 }
 0x6e7   :  { %1587 = vmatpush3.bf16.msra.mxu0 %v1689_v35 }
 0x6e8   :  { %1606 = vmatprep.subr.bf16.mxu0 %v1750_v0 }
 0x7ad   :  { %v514_v61 = vpop.f32.mrb[12].mxu0 }
 0x7ae   :  { %v521_v63 = vadd.f32 %v514_v61, %v1855_v6  ;;  %v1570_v1 = vpop.f32.mrb[13].mxu0 }
 0x7af   :  { %v517_v2 = vpop.f32.mrb[14].mxu0 }
 0x7b0   :  { %v1952_v3 = vadd.f32 %v1416_v62, %v521_v63  ;;  %v522_v4 = vadd.f32 %v517_v2, %v1857_v9  ;;  %v1571_v5 = vpop.f32.mrb[15].mxu0 }
 0x7b2   :  { %v1955_v7 = vadd.f32 %v1416_v62, %v522_v4  ;;  %v532_v8 = vsel %vm112_vm2, %v1952_v3, 0.0 }
 0x7b3   :  { %533 = vadd.xlane.f32.xlu1 %v532_v8  ;;  %v1691_v8 = vld [vmem:[%s2158_s4 + $0x18] sm:$0xff]  }
 0x7b4   :  { %v535_v10 = vsel %vm112_vm2, %v1955_v7, 0.0 }
 0x7b5   :  { %536 = vadd.xlane.f32.xlu0 %v535_v10 }
 0x840   :  { %v534_v11 = vpop.xlane.xlu1 %533 }
 0x841   :  { %v538_v12 = vmul.f32 0.03125, %v534_v11 }
 0x842   :  { %v537_v6 = vpop.xlane.xlu0 %536 }
 0x843   :  { %v540_v13 = vsub.f32 %v1952_v3, %v538_v12  ;;  %v539_v14 = vmul.f32 0.03125, %v537_v6 }
 0x845   :  { %v541_v15 = vsub.f32 %v1955_v7, %v539_v14  ;;  %v542_v9 = vmul.f32 %v540_v13, %v540_v13 }
 0x847   :  { %v544_v16 = vsel %vm112_vm2, %v542_v9, 0.0  ;;  %v543_v17 = vmul.f32 %v541_v15, %v541_v15 }
 0x848   :  { %545 = vadd.xlane.f32.xlu0 %v544_v16 }
 0x849   :  { %v547_v18 = vsel %vm112_vm2, %v543_v17, 0.0 }
 0x84a   :  { %548 = vadd.xlane.f32.xlu1 %v547_v18 }
 0x8d5   :  { %v546_v23 = vpop.xlane.xlu0 %545 }
 0x8d6   :  { %v550_v24 = vmul.f32 0.03125, %v546_v23 }
 0x8d7   :  { %v549_v25 = vpop.xlane.xlu1 %548 }
 0x8d8   :  { %v552_v26 = vadd.f32 1e-05, %v550_v24  ;;  %v551_v27 = vmul.f32 0.03125, %v549_v25 }
 0x8da   :  { %1722 = vrsqrt.f32 %v552_v26  ;;  %v553_v28 = vadd.f32 1e-05, %v551_v27 }
 0x8dc   :  { %1724 = vrsqrt.f32 %v553_v28 }
 0x8e4   :  { %v1723_v29 = vpop.eup %1722 }
 0x8e5   :  { %v556_v31 = vmul.f32 %v1723_v29, %v540_v13 }
 0x8e6   :  { %v1725_v30 = vpop.eup %1724 }
 0x8e7   :  { %v557_v32 = vmul.f32 %v1725_v30, %v541_v15 }
 0x8e9   :  { %v558_v33 = vpack.c.bf16 %v557_v32, %v556_v31 }
 0x8eb   :  { %1577 = vmatmul.mubr.msk.bf16.vlgmr.msra.gmra.mrb[12].mxu1 %vm112_vm2, %v558_v33 }
 0x8ec   :  { %1596 = vmatprep.mubr.msk.bf16.mxu1 %vm1751_vm0, %v1750_v0 }
 0x9be   :  { %v619_v37 = vpop.f32.mrb[12].mxu1 }
 0x9bf   :  { %v620_v38 = vadd.f32 %v1417_v36, %v619_v37  ;;  %v1578_v39 = vpop.f32.mrb[13].mxu1 }
 0x9c0   :  { %v622_v40 = vpop.f32.mrb[14].mxu1 }
 0x9c1   :  { %v623_v41 = vadd.f32 %v1417_v36, %v622_v40  ;;  %v1579_v42 = vpop.f32.mrb[15].mxu1  ;;  %v626_v43 = vmax.f32 %v620_v38, 0.0 }
 0x9c3   :  { %v627_v44 = vmax.f32 %v623_v41, 0.0 }
 0x9c5   :  { %v628_v45 = vpack.c.bf16 %v627_v44, %v626_v43 }
 0x9c7   :  { %1589 = vmatmul.mubr.msk.bf16.vlgmr.msra.gmra.mrb[16].mxu0 %vm661_vm3, %v628_v45 }
 0x9c8   :  { %1608 = vmatprep.mubr.msk.bf16.mxu0 %vm1751_vm0, %v1750_v0 }
 0xa9a   :  { %v699_v46 = vpop.f32.mrb[16].mxu0 }
 0xa9b   :  { %v706_v48 = vadd.f32 %v699_v46, %v1952_v3  ;;  %v1590_v50 = vpop.f32.mrb[17].mxu0 }
 0xa9c   :  { %v702_v52 = vpop.f32.mrb[18].mxu0 }
 0xa9d   :  { %v2002_v53 = vadd.f32 %v1426_v47, %v706_v48  ;;  %v707_v54 = vadd.f32 %v702_v52, %v1955_v7  ;;  %v1591_v55 = vpop.f32.mrb[19].mxu0  ;;  %v1690_v7 = vld [vmem:[%s2158_s4 + $0x10] sm:$0xff]  }
 0xa9e   :  { %1593 = vmatpush3.bf16.msra.mxu1 %v1690_v7 }
 0xa9f   :  { %v2005_v56 = vadd.f32 %v1426_v47, %v707_v54  ;;  %v717_v57 = vsel %vm112_vm2, %v2002_v53, 0.0  ;;  %1594 = vmatprep.subr.bf16.mxu1 %v1750_v0 }
 0xaa0   :  { %718 = vadd.xlane.f32.xlu0 %v717_v57 }
 0xaa1   :  { %v720_v58 = vsel %vm112_vm2, %v2005_v56, 0.0 }
 0xaa2   :  { %721 = vadd.xlane.f32.xlu1 %v720_v58  ;;  %1595 = vmatpush3.bf16.msra.mxu1 %v1691_v8 }
 0xaa3   :  { %1600 = vmatprep.subr.bf16.mxu1 %v1750_v0 }
 0xb2d   :  { %v719_v59 = vpop.xlane.xlu0 %718 }
 0xb2e   :  { %v723_v60 = vmul.f32 0.03125, %v719_v59 }
 0xb2f   :  { %v722_v61 = vpop.xlane.xlu1 %721 }
 0xb30   :  { %v725_v62 = vsub.f32 %v2002_v53, %v723_v60  ;;  %v724_v63 = vmul.f32 0.03125, %v722_v61 }
 0xb32   :  { %v726_v1 = vsub.f32 %v2005_v56, %v724_v63  ;;  %v727_v2 = vmul.f32 %v725_v62, %v725_v62 }
 0xb34   :  { %v729_v3 = vsel %vm112_vm2, %v727_v2, 0.0  ;;  %v728_v4 = vmul.f32 %v726_v1, %v726_v1 }
 0xb35   :  { %730 = vadd.xlane.f32.xlu0 %v729_v3 }
 0xb36   :  { %v732_v5 = vsel %vm112_vm2, %v728_v4, 0.0 }
 0xb37   :  { %733 = vadd.xlane.f32.xlu1 %v732_v5 }
 0xbc2   :  { %v731_v10 = vpop.xlane.xlu0 %730 }
 0xbc3   :  { %v735_v11 = vmul.f32 0.03125, %v731_v10 }
 0xbc4   :  { %v734_v12 = vpop.xlane.xlu1 %733 }
 0xbc5   :  { %v737_v6 = vadd.f32 1e-05, %v735_v11  ;;  %v736_v13 = vmul.f32 0.03125, %v734_v12 }
 0xbc7   :  { %1726 = vrsqrt.f32 %v737_v6  ;;  %v738_v14 = vadd.f32 1e-05, %v736_v13 }
 0xbc9   :  { %1728 = vrsqrt.f32 %v738_v14 }
 0xbd1   :  { %v1727_v15 = vpop.eup %1726 }
 0xbd2   :  { %v741_v16 = vmul.f32 %v1727_v15, %v725_v62 }
 0xbd3   :  { %v1729_v9 = vpop.eup %1728 }
 0xbd4   :  { %v742_v17 = vmul.f32 %v1729_v9, %v726_v1 }
 0xbd6   :  { %v743_v18 = vpack.c.bf16 %v742_v17, %v741_v16 }
 0xbd8   :  { %1597 = vmatmul.mubr.msk.bf16.vlgmr.msra.gmra.mrb[16].mxu1 %vm112_vm2, %v743_v18 }
 0xbd9   :  { %1602 = vmatprep.mubr.msk.bf16.mxu1 %vm1751_vm0, %v1750_v0 }
 0xcab   :  { %v806_v20 = vpop.f32.mrb[16].mxu1 }
 0xcac   :  { %v1598_v21 = vpop.f32.mrb[17].mxu1  ;;  %v807_v23 = vadd.f32 %v1432_v19, %v806_v20 }
 0xcad   :  { %v809_v22 = vpop.f32.mrb[18].mxu1 }
 0xcae   :  { %v810_v24 = vadd.f32 %v1432_v19, %v809_v22  ;;  %v1599_v25 = vpop.f32.mrb[19].mxu1 }
 0xcb0   :  { %v2029_v26 = vpack.c.bf16 %v810_v24, %v807_v23  ;;  %v1692_v23 = vld [vmem:[%s2161_s6 + $0x10] sm:$0xff]  }
 0xcb2   :  { %936 = vrot.lane.b32.xlu1 %v2029_v26, %s1752_s24  ;;  %815 = vrot.lane.b32.xlu0 %v2029_v26, %s1753_s25 }
 0xcb6   :  { %934 = vrot.lane.b32.xlu1 %v2029_v26, %s1754_s26 }
 0xd24   :  { %v816_v27 = vpop.permute.xlu0 %815  ;;  %v937_v29 = vpop.permute.xlu1 %936 }
 0xd25   :  { %v821_v28 = vsel %vm65_vm1, %v816_v27, 0  ;;  %v942_v30 = vsel %vm65_vm1, %v937_v29, 0 }
 0xd26   :  { %1601 = vmatpush3.bf16.xpose.msra.mxu1 %v821_v28  ;;  %v1693_v28 = vld [vmem:[%s2161_s6 + $0x18] sm:$0xff]  }
 0xd27   :  { %1612 = vmatprep.subr.bf16.mxu1 %v1750_v0 }
 0xd28   :  { %v935_v31 = vpop.permute.xlu1 %934 }
 0xd2d   :  { %1603 = vmatmul.mubr.msk.bf16.vlgmr.msra.gmra.mrb[20].mxu1 %vm65_vm1, %v2029_v26 }
 0xd2e   :  { %1613 = vmatpush3.bf16.xpose.msra.mxu1 %v942_v30  ;;  %1614 = vmatprep.mubr.msk.bf16.mxu1 %vm1751_vm0, %v1750_v0 }
 0xd2f   :  { %1624 = vmatprep.subr.bf16.mxu1 %v1750_v0 }
 0xd35   :  { %1615 = vmatmul.mubr.msk.bf16.vlgmr.msra.gmra.mrb[24].mxu1 %vm65_vm1, %v935_v31 }
 0xd36   :  { %1628 = vmatprep.mubr.msk.bf16.mxu1 %vm1751_vm0, %v1750_v0  ;;  %1625 = vmatpush3.bf16.msra.mxu1 %v1692_v23 }
 0xd37   :  { %1626 = vmatprep.subr.bf16.mxu1 %v1750_v0 }
 0xd3a   :  { %1627 = vmatpush3.bf16.msra.mxu1 %v1693_v28 }
 0xd3b   :  { %1640 = vmatprep.subr.bf16.mxu1 %v1750_v0 }
 0xe00   :  { %v857_v32 = vpop.f32.mrb[20].mxu1 }
 0xe01   :  { %v858_v33 = vadd.f32 %v857_v32, %v1903_v49  ;;  %v1604_v34 = vpop.f32.mrb[21].mxu1 }
 0xe02   :  { %v860_v35 = vpop.f32.mrb[22].mxu1 }
 0xe03   :  { %v861_v36 = vadd.f32 %v860_v35, %v1908_v51  ;;  %v1605_v37 = vpop.f32.mrb[23].mxu1  ;;  %v864_v38 = vsel %vm65_vm1, %v858_v33, -inf }
 0xe04   :  { %865 = vmax.xlane.f32.xlu1 %v864_v38 }
 0xe05   :  { %v867_v39 = vsel %vm65_vm1, %v861_v36, -inf }
 0xe06   :  { %868 = vmax.xlane.f32.xlu0 %v867_v39 }
 0xe08   :  { %v978_v40 = vpop.f32.mrb[24].mxu1 }
 0xe09   :  { %v979_v41 = vadd.f32 %v978_v40, %v1903_v49  ;;  %v1616_v42 = vpop.f32.mrb[25].mxu1 }
 0xe0a   :  { %v981_v43 = vpop.f32.mrb[26].mxu1 }
 0xe0b   :  { %v982_v44 = vadd.f32 %v981_v43, %v1908_v51  ;;  %v1617_v45 = vpop.f32.mrb[27].mxu1  ;;  %v985_v46 = vsel %vm65_vm1, %v979_v41, -inf }
 0xe0c   :  { %986 = vmax.xlane.f32.xlu0 %v985_v46 }
 0xe0d   :  { %v988_v47 = vsel %vm65_vm1, %v982_v44, -inf }
 0xe10   :  { %989 = vmax.xlane.f32.xlu0 %v988_v47 }
 0xe91   :  { %v866_v48 = vpop.xlane.xlu1 %865 }
 0xe92   :  { %v870_v50 = vsub.f32 %v858_v33, %v866_v48 }
 0xe93   :  { %v869_v52 = vpop.xlane.xlu0 %868 }
 0xe94   :  { %v872_v54 = vmul.f32 1.442695, %v870_v50  ;;  %v871_v55 = vsub.f32 %v861_v36, %v869_v52 }
 0xe96   :  { %1730 = vpow2.f32 %v872_v54  ;;  %v874_v57 = vmul.f32 1.442695, %v871_v55 }
 0xe98   :  { %1732 = vpow2.f32 %v874_v57 }
 0xe99   :  { %v987_v49 = vpop.xlane.xlu0 %986 }
 0xe9a   :  { %v991_v58 = vsub.f32 %v979_v41, %v987_v49  ;;  %v1448_v41 = vld [vmem:[%s2162_s7 + $0x1] ss:$0 sm:$0xff] }
 0xe9c   :  { %v993_v59 = vmul.f32 1.442695, %v991_v58 }
 0xe9d   :  { %v990_v60 = vpop.xlane.xlu0 %989 }
 0xe9e   :  { %1734 = vpow2.f32 %v993_v59  ;;  %v992_v51 = vsub.f32 %v982_v44, %v990_v60 }
 0xea0   :  { %v1731_v61 = vpop.eup %1730  ;;  %v995_v62 = vmul.f32 1.442695, %v992_v51 }
 0xea1   :  { %v876_v63 = vsel %vm65_vm1, %v1731_v61, 0.0 }
 0xea2   :  { %v1733_v1 = vpop.eup %1732  ;;  %1736 = vpow2.f32 %v995_v62  ;;  %877 = vadd.xlane.f32.xlu1 %v876_v63  ;;  %v1695_v62 = vld [vmem:[%s2163_s8 + $0x18] sm:$0xff]   ;;  %v1696_v63 = vld [vmem:[%s2164_s10 + $0x20] sm:$0xff]  }
 0xea3   :  { %v879_v2 = vsel %vm65_vm1, %v1733_v1, 0.0 }
 0xea4   :  { %880 = vadd.xlane.f32.xlu0 %v879_v2 }
 0xea8   :  { %v1735_v3 = vpop.eup %1734 }
 0xea9   :  { %v997_v4 = vsel %vm65_vm1, %v1735_v3, 0.0 }
 0xeaa   :  { %998 = vadd.xlane.f32.xlu1 %v997_v4 }
 0xeac   :  { %v1737_v5 = vpop.eup %1736 }
 0xead   :  { %v1000_v7 = vsel %vm65_vm1, %v1737_v5, 0.0 }
 0xeae   :  { %1001 = vadd.xlane.f32.xlu0 %v1000_v7 }
 0xebb   :  { %887 = vrot.lane.b32.xlu1 %v2029_v26, %s1755_s2 }
 0xec4   :  { %1008 = vrot.lane.b32.xlu0 %v2029_v26, %s1756_s15 }
 0xf2f   :  { %v878_v8 = vpop.xlane.xlu1 %877 }
 0xf30   :  { %1738 = vrcp.f32 %v878_v8 }
 0xf31   :  { %v881_v10 = vpop.xlane.xlu0 %880 }
 0xf32   :  { %1740 = vrcp.f32 %v881_v10 }
 0xf37   :  { %v999_v11 = vpop.xlane.xlu1 %998 }
 0xf38   :  { %1742 = vrcp.f32 %v999_v11 }
 0xf3a   :  { %v1739_v12 = vpop.eup %1738 }
 0xf3b   :  { %v888_v6 = vpop.permute.xlu1 %887  ;;  %v1002_v13 = vpop.xlane.xlu0 %1001  ;;  %v884_v15 = vmul.f32 %v1739_v12, %v1731_v61  ;;  %v1694_v61 = vld [vmem:[%s2163_s8 + $0x10] sm:$0xff]  }
 0xf3c   :  { %v1741_v14 = vpop.eup %1740  ;;  %1744 = vrcp.f32 %v1002_v13  ;;  %1607 = vmatpush3.bf16.msra.mxu0 %v888_v6 }
 0xf3d   :  { %v885_v9 = vmul.f32 %v1741_v14, %v1733_v1  ;;  %1618 = vmatprep.subr.bf16.mxu0 %v1750_v0  ;;  %v1697_v1 = vld [vmem:[%s2164_s10 + $0x28] sm:$0xff]   ;;  %v1698_v14 = vld [vmem:[%s2164_s10 + $0x30] sm:$0xff]  }
 0xf3f   :  { %v1009_v16 = vpop.permute.xlu0 %1008  ;;  %v886_v17 = vpack.c.bf16 %v885_v9, %v884_v15  ;;  %v1699_v15 = vld [vmem:[%s2164_s10 + $0x38] sm:$0xff]   ;;  %v1454_v9 = vld [vmem:[%s2165_s9 + $0x1] ss:$0 sm:$0xff] }
 0xf41   :  { %1609 = vmatmul.mubr.msk.bf16.vlgmr.msra.gmra.mrb[20].mxu0 %vm65_vm1, %v886_v17 }
 0xf42   :  { %1619 = vmatpush3.bf16.msra.mxu0 %v1009_v16  ;;  %1620 = vmatprep.mubr.msk.bf16.mxu0 %vm1751_vm0, %v1750_v0  ;;  %v1743_v18 = vpop.eup %1742 }
 0xf43   :  { %1632 = vmatprep.subr.bf16.mxu0 %v1750_v0  ;;  %v1005_v20 = vmul.f32 %v1743_v18, %v1735_v3 }
 0xf46   :  { %v1745_v19 = vpop.eup %1744 }
 0xf47   :  { %v1006_v21 = vmul.f32 %v1745_v19, %v1737_v5 }
 0xf49   :  { %v1007_v22 = vpack.c.bf16 %v1006_v21, %v1005_v20 }
 0xf4b   :  { %1621 = vmatmul.mubr.msk.bf16.vlgmr.msra.gmra.mrb[24].mxu0 %vm65_vm1, %v1007_v22 }
 0xf4c   :  { %1636 = vmatprep.mubr.msk.bf16.mxu0 %vm1751_vm0, %v1750_v0  ;;  %1633 = vmatpush3.bf16.msra.mxu0 %v1694_v61 }
 0xf4d   :  { %1634 = vmatprep.subr.bf16.mxu0 %v1750_v0 }
 0xf50   :  { %1635 = vmatpush3.bf16.msra.mxu0 %v1695_v62 }
 0xf51   :  { %1652 = vmatprep.subr.bf16.mxu0 %v1750_v0 }
0x1014   :  { %v927_v24 = vpop.f32.mrb[20].mxu0 }
0x1015   :  { %v1610_v25 = vpop.f32.mrb[21].mxu0 }
0x1016   :  { %v930_v26 = vpop.f32.mrb[22].mxu0  ;;  %v1700_v25 = vld [vmem:[%s2167_s12] sm:$0xff]  }
0x1017   :  { %v1611_v27 = vpop.f32.mrb[23].mxu0 }
0x101e   :  { %v1048_v29 = vpop.f32.mrb[24].mxu0 }
0x101f   :  { %v1622_v30 = vpop.f32.mrb[25].mxu0 }
0x1020   :  { %v1051_v31 = vpop.f32.mrb[26].mxu0  ;;  %v1472_v30 = vld [vmem:[%s2166_s11 + $0x1] ss:$0 sm:$0xff] }
0x1021   :  { %v1673_v32 = vpack.i.bf16 %v1051_v31, %v1048_v29  ;;  %v1623_v33 = vpop.f32.mrb[27].mxu0 }
0x1023   :  { %1674 = vrot.lane.b32.xlu1 %v1673_v32, %s1757_s18 }
0x1095   :  { %v1675_v34 = vpop.permute.xlu1 %1674 }
0x1096   :  { %v1677_v35 = vunpack.i.h.bf16 %v1675_v34  ;;  %v1676_v36 = vunpack.i.l.bf16 %v1675_v34 }
0x1098   :  { %v1064_v37 = vsel %vm65_vm1, %v930_v26, %v1677_v35  ;;  %v1063_v38 = vsel %vm65_vm1, %v927_v24, %v1676_v36  ;;  %v1701_v26 = vld [vmem:[%s2167_s12 + $0x8] sm:$0xff]   ;;  %v1473_v36 = vld [vmem:[%s2168_s13] ss:$0 sm:$0xff] }
0x1099   :  { %v1065_v39 = vpack.c.bf16 %v1064_v37, %v1063_v38 }
0x109b   :  { %1629 = vmatmul.mubr.msk.bf16.vlgmr.msra.gmra.mrb[28].mxu1 %vm112_vm2, %v1065_v39 }
0x109c   :  { %1648 = vmatprep.mubr.msk.bf16.mxu1 %vm1751_vm0, %v1750_v0  ;;  %1641 = vmatpush3.bf16.msra.mxu1 %v1696_v63 }
0x109d   :  { %1642 = vmatprep.subr.bf16.mxu1 %v1750_v0 }
0x10a0   :  { %1643 = vmatpush3.bf16.msra.mxu1 %v1697_v1 }
0x10a1   :  { %1644 = vmatprep.subr.bf16.mxu1 %v1750_v0 }
0x10a4   :  { %1645 = vmatpush3.bf16.msra.mxu1 %v1698_v14 }
0x10a5   :  { %1646 = vmatprep.subr.bf16.mxu1 %v1750_v0 }
0x10a8   :  { %1647 = vmatpush3.bf16.msra.mxu1 %v1699_v15 }
0x116e   :  { %v1120_v40 = vpop.f32.mrb[28].mxu1 }
0x116f   :  { %v1127_v42 = vadd.f32 %v1120_v40, %v2002_v53  ;;  %v1630_v43 = vpop.f32.mrb[29].mxu1 }
0x1170   :  { %v1123_v44 = vpop.f32.mrb[30].mxu1 }
0x1171   :  { %v2090_v45 = vadd.f32 %v1448_v41, %v1127_v42  ;;  %v1128_v46 = vadd.f32 %v1123_v44, %v2005_v56  ;;  %v1631_v47 = vpop.f32.mrb[31].mxu1 }
0x1173   :  { %v2093_v48 = vadd.f32 %v1448_v41, %v1128_v46  ;;  %v1139_v50 = vsel %vm112_vm2, %v2090_v45, 0.0 }
0x1174   :  { %1140 = vadd.xlane.f32.xlu1 %v1139_v50 }
0x1175   :  { %v1142_v52 = vsel %vm112_vm2, %v2093_v48, 0.0 }
0x1176   :  { %1143 = vadd.xlane.f32.xlu0 %v1142_v52 }
0x1201   :  { %v1141_v54 = vpop.xlane.xlu1 %1140 }
0x1202   :  { %v1145_v55 = vmul.f32 0.03125, %v1141_v54 }
0x1203   :  { %v1144_v53 = vpop.xlane.xlu0 %1143 }
0x1204   :  { %v1147_v57 = vsub.f32 %v2090_v45, %v1145_v55  ;;  %v1146_v49 = vmul.f32 0.03125, %v1144_v53 }
0x1206   :  { %v1148_v58 = vsub.f32 %v2093_v48, %v1146_v49  ;;  %v1149_v56 = vmul.f32 %v1147_v57, %v1147_v57 }
0x1208   :  { %v1151_v59 = vsel %vm112_vm2, %v1149_v56, 0.0  ;;  %v1150_v60 = vmul.f32 %v1148_v58, %v1148_v58 }
0x1209   :  { %1152 = vadd.xlane.f32.xlu0 %v1151_v59 }
0x120a   :  { %v1154_v51 = vsel %vm112_vm2, %v1150_v60, 0.0 }
0x120b   :  { %1155 = vadd.xlane.f32.xlu1 %v1154_v51 }
0x1296   :  { %v1153_v2 = vpop.xlane.xlu0 %1152 }
0x1297   :  { %v1157_v3 = vmul.f32 0.03125, %v1153_v2 }
0x1298   :  { %v1156_v4 = vpop.xlane.xlu1 %1155 }
0x1299   :  { %v1159_v5 = vadd.f32 1e-05, %v1157_v3  ;;  %v1158_v7 = vmul.f32 0.03125, %v1156_v4 }
0x129b   :  { %1746 = vrsqrt.f32 %v1159_v5  ;;  %v1160_v8 = vadd.f32 1e-05, %v1158_v7 }
0x129d   :  { %1748 = vrsqrt.f32 %v1160_v8 }
0x12a5   :  { %v1747_v10 = vpop.eup %1746 }
0x12a6   :  { %v1163_v12 = vmul.f32 %v1747_v10, %v1147_v57 }
0x12a7   :  { %v1749_v11 = vpop.eup %1748 }
0x12a8   :  { %v1164_v6 = vmul.f32 %v1749_v11, %v1148_v58 }
0x12aa   :  { %v1165_v13 = vpack.c.bf16 %v1164_v6, %v1163_v12 }
0x12ac   :  { %1637 = vmatmul.mubr.msk.bf16.vlgmr.msra.gmra.mrb[28].mxu0 %vm112_vm2, %v1165_v13 }
0x12ad   :  { %1656 = vmatprep.mubr.msk.bf16.mxu0 %vm1751_vm0, %v1750_v0  ;;  %1653 = vmatpush3.bf16.msra.mxu0 %v1700_v25 }
0x12ae   :  { %1654 = vmatprep.subr.bf16.mxu0 %v1750_v0 }
0x12b1   :  { %1655 = vmatpush3.bf16.msra.mxu0 %v1701_v26 }
0x137f   :  { %v1228_v16 = vpop.f32.mrb[28].mxu0 }
0x1380   :  { %v1229_v17 = vadd.f32 %v1454_v9, %v1228_v16  ;;  %v1638_v18 = vpop.f32.mrb[29].mxu0 }
0x1381   :  { %v1231_v19 = vpop.f32.mrb[30].mxu0 }
0x1382   :  { %v1232_v20 = vadd.f32 %v1454_v9, %v1231_v19  ;;  %v1639_v21 = vpop.f32.mrb[31].mxu0  ;;  %v1235_v22 = vmax.f32 %v1229_v17, 0.0 }
0x1384   :  { %v1236_v23 = vmax.f32 %v1232_v20, 0.0 }
0x1386   :  { %v1237_v24 = vpack.c.bf16 %v1236_v23, %v1235_v22 }
0x1388   :  { %1649 = vmatmul.mubr.msk.bf16.vlgmr.msra.gmra.mrb[32].mxu1 %vm661_vm3, %v1237_v24 }
0x145b   :  { %v1308_v27 = vpop.f32.mrb[32].mxu1 }
0x145c   :  { %v1315_v28 = vadd.f32 %v1308_v27, %v2090_v45  ;;  %v1650_v29 = vpop.f32.mrb[33].mxu1 }
0x145d   :  { %v1311_v31 = vpop.f32.mrb[34].mxu1 }
0x145e   :  { %v1316_v32 = vadd.f32 %v1311_v31, %v2093_v48  ;;  %v1651_v33 = vpop.f32.mrb[35].mxu1  ;;  %v1325_v34 = vadd.f32 %v1472_v30, %v1315_v28 }
0x1460   :  { %v1326_v35 = vadd.f32 %v1472_v30, %v1316_v32 }
0x1462   :  { %v1327_v0 = vpack.c.bf16 %v1326_v35, %v1325_v34 }
0x1464   :  { %1657 = vmatmul.mubr.msk.bf16.vlgmr.msra.gmra.mrb[32].mxu0 %vm112_vm2, %v1327_v0 }
0x1537   :  { %v1388_v37 = vpop.f32.mrb[32].mxu0 }
0x1538   :  { %v1389_v38 = vadd.f32 %v1473_v36, %v1388_v37  ;;  %v1658_v39 = vpop.f32.mrb[33].mxu0 }
0x1539   :  { %v1391_v40 = vpop.f32.mrb[34].mxu0 }
0x153a   :  { %1396 = vst.msk [vmem:[%s2169_s14] sm:$0xff] %vm1395_vm4, %v1389_v38  ;;  %v1392_v41 = vadd.f32 %v1473_v36, %v1391_v40  ;;  %v1659_v42 = vpop.f32.mrb[35].mxu0 }
0x153c   :  { %1397 = vst.msk [vmem:[%s2169_s14 + $0x8] sm:$0xff] %vm1395_vm4, %v1392_v41 }

</bundles_post_ra>
